<compile_context>
chip_gen: v7x
topology: tpu7x:2x2x1
jax: 0.10.0
libtpu: 0.0.40
codegen_flags: <defaults>
</compile_context>

<pallas_src>
import functools

import numpy as np
import jax
import jax.numpy as jnp
from jax import lax
from jax.experimental import pallas as pl
from jax.experimental.pallas import tpu as pltpu

# ---------------- deterministic "parameters" (SMOKE defaults) ----------------
DEPTH_REF = (28.01, 16.32)                       # smoke_coder.depth_ref
DIM_REF = ((3.88, 1.63, 1.53),                   # smoke_coder.dim_ref (car, cyclist, ped)
           (1.78, 1.70, 0.58),
           (0.88, 1.73, 0.67))
NUM_CLASSES = len(DIM_REF)
REG_HEAD = 8                                     # [depth, dx, dy, dl, dh, dw, sin, cos]
DET_THRESHOLD = 0.25
MAX_DETECTION = 8
PRED_2D = True


# =============================== Kernel 1: nms_hm ===============================
def _nms_kernel_packed(hm_ref, out_ref, *, w):
    """Planes packed along the lane axis: shape (H, Lpad), Lpad multiple of 128.

    Separable 3x3 max with implicit -inf padding == F.max_pool2d(k=3, s=1, p=1).
    Per-plane column boundaries are enforced with (lane % w) masks, so the lane
    rolls may freely cross plane (and zero-pad) boundaries.
    """
    H, L = hm_ref.shape
    ri = lax.broadcasted_iota(jnp.int32, (H, L), 0)
    ci = lax.broadcasted_iota(jnp.int32, (H, L), 1)
    cw = ci % w                                           # lane index within its plane
    h = hm_ref[...]
    left = jnp.where(cw >= 1, pltpu.roll(h, shift=1, axis=1), -jnp.inf)        # h[:, j-1]
    right = jnp.where(cw <= w - 2, pltpu.roll(h, shift=L - 1, axis=1), -jnp.inf)  # h[:, j+1]
    rmax = jnp.maximum(h, jnp.maximum(left, right))
    up = jnp.where(ri >= 1, pltpu.roll(rmax, shift=1, axis=0), -jnp.inf)       # rmax[i-1, :]
    down = jnp.where(ri <= H - 2, pltpu.roll(rmax, shift=H - 1, axis=0), -jnp.inf)  # rmax[i+1, :]
    hmax = jnp.maximum(rmax, jnp.maximum(up, down))
    out_ref[...] = jnp.where(hmax == h, h, 0.0)           # single VPU select, no mul/cast


def _nms_kernel_3d(hm_ref, out_ref):
    """Native (P, H, W) layout for W >= 128: one whole-block roll/max/select chain."""
    P, H, W = hm_ref.shape
    ri = lax.broadcasted_iota(jnp.int32, (H, W), 0)
    ci = lax.broadcasted_iota(jnp.int32, (H, W), 1)
    h = hm_ref[...]
    left = jnp.where(ci >= 1, pltpu.roll(h, shift=1, axis=2), -jnp.inf)
    right = jnp.where(ci <= W - 2, pltpu.roll(h, shift=W - 1, axis=2), -jnp.inf)
    rmax = jnp.maximum(h, jnp.maximum(left, right))
    up = jnp.where(ri >= 1, pltpu.roll(rmax, shift=1, axis=1), -jnp.inf)
    down = jnp.where(ri <= H - 2, pltpu.roll(rmax, shift=H - 1, axis=1), -jnp.inf)
    hmax = jnp.maximum(rmax, jnp.maximum(up, down))
    out_ref[...] = jnp.where(hmax == h, h, 0.0)


def nms_hm(heat):
    B, C, H, W = heat.shape
    BC = B * C
    if W < 128:
        # Pack planes into lanes -> dense 128-lane vregs for every roll/select/max.
        L = BC * W
        Lp = ((L + 127) // 128) * 128
        packed = heat.transpose(2, 0, 1, 3).reshape(H, L)           # (H, BC*W), plane-major
        if Lp != L:
            packed = jnp.pad(packed, ((0, 0), (0, Lp - L)))         # pad value irrelevant (masked)
        out = pl.pallas_call(
            functools.partial(_nms_kernel_packed, w=W),
            out_shape=jax.ShapeDtypeStruct((H, Lp), heat.dtype),
            cost_estimate=pl.CostEstimate(flops=12 * H * Lp, transcendentals=0,
                                          bytes_accessed=8 * H * Lp),
        )(packed)
        return out[:, :L].reshape(H, B, C, W).transpose(1, 2, 0, 3)
    else:
        flat = heat.reshape(BC, H, W)
        out = pl.pallas_call(
            _nms_kernel_3d,
            out_shape=jax.ShapeDtypeStruct((BC, H, W), heat.dtype),
            cost_estimate=pl.CostEstimate(flops=12 * BC * H * W, transcendentals=0,
                                          bytes_accessed=8 * BC * H * W),
        )(flat)
        return out.reshape(B, C, H, W)


# ============================ Kernel 2: decode + box2d ==========================
# Fused input row layout (38 rows x NP lanes):
_ROW_XS, _ROW_YS, _ROW_CLS = 0, 1, 2
_ROW_REG = 3          # 8 rows: depth, dx, dy, dl, dh, dw, sin, cos
_ROW_KINV = 11        # 9 rows
_ROW_TINV = 20        # 9 rows
_ROW_KMAT = 29        # 9 rows
_NUM_IN_ROWS = 38
_NUM_OUT_ROWS = 14    # xmin ymin xmax ymax | h w l | lx ly lz | sin_a cos_a sin_r cos_r


def _decode_kernel(in_ref, dref_ref, dimref_ref, size_ref, out_ref, *, num_classes):
    def row(i):                                        # (1, NP) static sublane slice
        return in_ref[i:i + 1, :]

    xs = row(_ROW_XS)
    ys = row(_ROW_YS)
    cls = row(_ROW_CLS)

    # decode_depth
    depth = row(_ROW_REG + 0) * dref_ref[1] + dref_ref[0]

    # decode_location: loc = K^-1 @ (depth * (trans_mat^-1 @ [x+dx, y+dy, 1]))
    px = xs + row(_ROW_REG + 1)
    py = ys + row(_ROW_REG + 2)
    q0 = row(_ROW_TINV + 0) * px + row(_ROW_TINV + 1) * py + row(_ROW_TINV + 2)
    q1 = row(_ROW_TINV + 3) * px + row(_ROW_TINV + 4) * py + row(_ROW_TINV + 5)
    q2 = row(_ROW_TINV + 6) * px + row(_ROW_TINV + 7) * py + row(_ROW_TINV + 8)
    q0 = q0 * depth
    q1 = q1 * depth
    q2 = q2 * depth
    lx = row(_ROW_KINV + 0) * q0 + row(_ROW_KINV + 1) * q1 + row(_ROW_KINV + 2) * q2
    ly = row(_ROW_KINV + 3) * q0 + row(_ROW_KINV + 4) * q1 + row(_ROW_KINV + 5) * q2
    lz = row(_ROW_KINV + 6) * q0 + row(_ROW_KINV + 7) * q1 + row(_ROW_KINV + 8) * q2

    # decode_dimension: dims = exp(offset) * dim_ref[cls]
    r0 = jnp.zeros_like(xs)
    r1 = jnp.zeros_like(xs)
    r2 = jnp.zeros_like(xs)
    for c in range(num_classes):
        m = cls == jnp.float32(c)
        r0 = jnp.where(m, dimref_ref[3 * c + 0], r0)
        r1 = jnp.where(m, dimref_ref[3 * c + 1], r1)
        r2 = jnp.where(m, dimref_ref[3 * c + 2], r2)
    d0 = jnp.exp(row(_ROW_REG + 3)) * r0               # l
    d1 = jnp.exp(row(_ROW_REG + 4)) * r1               # h
    d2 = jnp.exp(row(_ROW_REG + 5)) * r2               # w

    # locations[:, 1] += dims[:, 1] / 2
    ly = ly + 0.5 * d1

    # decode_orientation (analytic sin/cos; glue recovers angles with atan2).
    s1 = row(_ROW_REG + 6)
    c1_raw = row(_ROW_REG + 7)
    c1 = c1_raw + 1e-7
    inv_a = lax.rsqrt(s1 * s1 + c1 * c1)
    sgn_c1 = jnp.where(c1 >= 0.0, 1.0, -1.0)
    sin_at = s1 * sgn_c1 * inv_a                       # sin(atan(s1 / c1))
    cos_at = jnp.abs(c1) * inv_a                       # cos(atan(s1 / c1))
    pos = c1_raw >= 0.0
    cos_alpha = jnp.where(pos, sin_at, -sin_at)        # alpha = atan(.) -/+ pi/2
    sin_alpha = jnp.where(pos, -cos_at, cos_at)

    lz_e = lz + 1e-7
    inv_r = lax.rsqrt(lx * lx + lz_e * lz_e)
    sgn_lz = jnp.where(lz_e >= 0.0, 1.0, -1.0)
    sin_ray = lx * sgn_lz * inv_r
    cos_ray = jnp.abs(lz_e) * inv_r

    cos_r = cos_alpha * cos_ray - sin_alpha * sin_ray
    sin_r = sin_alpha * cos_ray + cos_alpha * sin_ray

    # Hoist the 9 K-matrix rows once.
    k00 = row(_ROW_KMAT + 0); k01 = row(_ROW_KMAT + 1); k02 = row(_ROW_KMAT + 2)
    k10 = row(_ROW_KMAT + 3); k11 = row(_ROW_KMAT + 4); k12 = row(_ROW_KMAT + 5)
    k20 = row(_ROW_KMAT + 6); k21 = row(_ROW_KMAT + 7); k22 = row(_ROW_KMAT + 8)

    # encode_box3d: the 8 corners batched along the sublane axis -> (8, NP) vreg math.
    # Corner coefficient tables (from SMOKE's gather table) built from an iota:
    #   CX = [-.5,.5,.5,.5,.5,-.5,-.5,-.5]   CY = [-1,-1,0,0,-1,-1,0,0]
    #   CZ = [-.5,-.5,-.5,.5,.5,.5,.5,-.5]
    npl = xs.shape[1]
    cidx = lax.broadcasted_iota(jnp.int32, (8, npl), 0)
    cx = jnp.where((cidx >= 1) & (cidx <= 4), 0.5, -0.5)
    cy = jnp.where((cidx % 4) <= 1, -1.0, 0.0)
    cz = jnp.where((cidx >= 3) & (cidx <= 6), 0.5, -0.5)
    ox = cx * d0                                       # (8, NP)
    oy = cy * d1
    oz = cz * d2
    bx = cos_r * ox + sin_r * oz + lx
    by = oy + ly
    bz = -sin_r * ox + cos_r * oz + lz
    # NOTE: den can be <=0 for points behind the camera (same hazard as the PyTorch
    # reference); parity is kept, no extra guarding.  Exact reciprocal for parity.
    den = k20 * bx + k21 * by + k22 * bz
    inv_den = pl.reciprocal(den)                       # one reciprocal for all 8 corners
    u = (k00 * bx + k01 * by + k02 * bz) * inv_den
    v = (k10 * bx + k11 * by + k12 * bz) * inv_den
    xmin = jnp.min(u, axis=0, keepdims=True)           # XLU 8-way reductions
    xmax = jnp.max(u, axis=0, keepdims=True)
    ymin = jnp.min(v, axis=0, keepdims=True)
    ymax = jnp.max(v, axis=0, keepdims=True)

    img_w = size_ref[0]
    img_h = size_ref[1]
    out = jnp.concatenate([
        jnp.clip(xmin, 0.0, img_w),
        jnp.clip(ymin, 0.0, img_h),
        jnp.clip(xmax, 0.0, img_w),
        jnp.clip(ymax, 0.0, img_h),
        d1, d2, d0,                                    # dims rolled by -1: (h, w, l)
        lx, ly, lz,
        sin_alpha, cos_alpha, sin_r, cos_r], axis=0)
    out_ref[...] = out


# =============================== forward (glue) =================================
def post_process_forward(pred_heatmap, pred_regression, trans_mats, Ks, sizes):
    B, C, H, W = pred_heatmap.shape
    Kdet = MAX_DETECTION

    heat = nms_hm(pred_heatmap)

    # --- select_topk (data-dependent sort -> plain JAX glue) ---
    # TODO(synk): top-k has no clean Pallas TPU equivalent; done with lax.top_k.
    flat = heat.reshape(B, C, H * W)
    scores_all, inds_all = lax.top_k(flat, Kdet)              # (B, C, K)
    ys_all = (inds_all // W).astype(jnp.float32)
    xs_all = (inds_all % W).astype(jnp.float32)
    scores, inds = lax.top_k(scores_all.reshape(B, C * Kdet), Kdet)   # (B, K)
    clses = (inds // Kdet).astype(jnp.float32)

    def gather_feat(f):
        return jnp.take_along_axis(f.reshape(B, C * Kdet), inds, axis=1)

    spat_inds = gather_feat(inds_all)                          # (B, K) int32
    ys = gather_feat(ys_all)
    xs = gather_feat(xs_all)

    # --- select_point_of_interest: gather K points straight from (B, R, H*W) ---
    R = pred_regression.shape[1]
    fm = pred_regression.reshape(B, R, H * W)
    idx = jnp.broadcast_to(spat_inds[:, None, :], (B, R, Kdet))
    reg_brk = jnp.take_along_axis(fm, idx, axis=2)             # (B, R, K)
    N = B * Kdet
    reg_rows = reg_brk.transpose(1, 0, 2).reshape(R, N)        # (R, N), det order b*K+k

    # per-detection camera / trans matrices (tiny 3x3 inverses -> glue)
    # TODO(synk): 3x3 matrix inverse kept in plain JAX (jnp.linalg.inv).
    obj = jnp.repeat(jnp.arange(B), Kdet)
    Kinv_rows = jnp.linalg.inv(Ks)[obj].reshape(N, 9).T                # (9, N)
    Tinv_rows = jnp.linalg.inv(trans_mats)[obj].reshape(N, 9).T        # (9, N)
    Kmat_rows = Ks[obj].reshape(N, 9).T                                # (9, N)

    # Fuse all row operands into one (38, N) slab, zero-pad the detection axis to a
    # lane-dense multiple of 128 once, and pass it as a single VMEM operand.
    packed_rows = jnp.concatenate([
        xs.reshape(1, N), ys.reshape(1, N), clses.reshape(1, N),
        reg_rows, Kinv_rows, Tinv_rows, Kmat_rows], axis=0).astype(jnp.float32)
    NP = max(128, ((N + 127) // 128) * 128)
    if NP != N:
        packed_rows = jnp.pad(packed_rows, ((0, 0), (0, NP - N)))   # zero pad (lanes sliced off)

    depth_ref_arr = jnp.asarray(DEPTH_REF, jnp.float32)                 # (2,)
    dimref_flat = jnp.asarray(DIM_REF, jnp.float32).reshape(-1)         # (9,)
    # reference flattens the whole (B, 2) size tensor and uses elements [0], [1]
    # (i.e. the first image's (w, h)) for clamping -- reproduced exactly.
    size_arr = jnp.asarray(sizes, jnp.float32).reshape(-1)[:2]          # (2,)

    dec = pl.pallas_call(
        functools.partial(_decode_kernel, num_classes=NUM_CLASSES),
        out_shape=jax.ShapeDtypeStruct((_NUM_OUT_ROWS, NP), jnp.float32),
        in_specs=[pl.BlockSpec(memory_space=pltpu.MemorySpace.VMEM),
                  pl.BlockSpec(memory_space=pltpu.MemorySpace.SMEM),
                  pl.BlockSpec(memory_space=pltpu.MemorySpace.SMEM),
                  pl.BlockSpec(memory_space=pltpu.MemorySpace.SMEM)],
        out_specs=pl.BlockSpec(memory_space=pltpu.MemorySpace.VMEM),
        cost_estimate=pl.CostEstimate(flops=300 * NP, transcendentals=16 * NP,
                                      bytes_accessed=4 * (_NUM_IN_ROWS + _NUM_OUT_ROWS) * NP),
    )(packed_rows, depth_ref_arr, dimref_flat, size_arr)

    dec = dec[:, :N]
    box2d = dec[0:4].T                                  # (N, 4)
    dims_rolled = dec[4:7].T                            # (N, 3)  roll(-1): (h, w, l)
    locs = dec[7:10].T                                  # (N, 3)  (y already += h/2)

    # decode_orientation output angles from the kernel's sin/cos rows.
    # TODO(synk): atan2 has no guaranteed Mosaic lowering; tiny angle math stays in glue.
    alphas = jnp.arctan2(dec[10], dec[11])              # atan2(sin_alpha, cos_alpha)
    rotys = jnp.arctan2(dec[12], dec[13])               # atan2(sin_roty, cos_roty) in (-pi, pi]

    if not PRED_2D:
        box2d = jnp.zeros_like(box2d)   # TODO(synk): reference returns a bare [0,0,0,0]

    result = jnp.concatenate([
        clses.reshape(-1, 1), alphas.reshape(-1, 1), box2d,
        dims_rolled, locs, rotys.reshape(-1, 1), scores.reshape(-1, 1)], axis=1)
    keep = result[:, -1] > DET_THRESHOLD          # boolean mask; applied outside jit
    return result, keep


# ==================================== demo ======================================
if __name__ == "__main__":
    key = jax.random.PRNGKey(0)
    B, C, H, W = 2, NUM_CLASSES, 16, 16
    k1, k2 = jax.random.split(key, 2)

    pred_heatmap = jax.nn.sigmoid(jax.random.normal(k1, (B, C, H, W), jnp.float32))
    pred_regression = 0.1 * jax.random.normal(k2, (B, REG_HEAD, H, W), jnp.float32)

    f = 64.0
    K0 = jnp.array([[f, 0.0, 2.0 * W], [0.0, f, 2.0 * H], [0.0, 0.0, 1.0]], jnp.float32)
    K1 = K0.at[0, 0].set(1.1 * f).at[1, 1].set(1.1 * f)
    Ks = jnp.stack([K0, K1])

    T0 = jnp.array([[4.0, 0.0, 1.0], [0.0, 4.0, 2.0], [0.0, 0.0, 1.0]], jnp.float32)
    T1 = T0.at[0, 2].set(3.0)
    trans_mats = jnp.stack([T0, T1])

    sizes = jnp.array([[4.0 * W, 4.0 * H], [4.0 * W, 4.0 * H]], jnp.float32)

    fwd = jax.jit(post_process_forward)
    result, keep = fwd(pred_heatmap, pred_regression, trans_mats, Ks, sizes)
    result = jax.block_until_ready(result)
    keep = jax.block_until_ready(keep)

    # dynamic-shape filtering (result = result[keep_idx]) happens outside jit.
    final = np.asarray(result)[np.asarray(keep)]
    assert result.shape == (B * MAX_DETECTION, 14)
    assert final.ndim == 2 and final.shape[1] == 14
    assert np.all(np.isfinite(final))
    print("KERNEL_OK")
</pallas_src>

<mosaic_0001>
module attributes {stable_mosaic.version = 11 : i64} {
  func.func @_nms_kernel_packed(%arg0: memref<16x128xf32, #tpu.memory_space<vmem>>, %arg1: memref<16x128xf32, #tpu.memory_space<vmem>>) attributes {dimension_semantics = [], scalar_prefetch = 0 : i64, scratch_operands = 0 : i64, tpu.core_type = #tpu.core_type<tc>} {
    %0 = tpu.iota {dimensions = array<i32: 0>} : vector<16x128xi32>
    %1 = tpu.iota {dimensions = array<i32: 1>} : vector<16x128xi32>
    %c16_i32 = arith.constant 16 : i32
    %c0_i32 = arith.constant 0 : i32
    %2 = arith.cmpi eq, %c16_i32, %c0_i32 : i32
    %c1_i32 = arith.constant 1 : i32
    %3 = arith.select %2, %c1_i32, %c16_i32 : i32
    %4 = vector.broadcast %3 : i32 to vector<16x128xi32>
    %5 = arith.remsi %1, %4 : vector<16x128xi32>
    %c0_i32_0 = arith.constant 0 : i32
    %6 = vector.broadcast %c0_i32_0 : i32 to vector<16x128xi32>
    %7 = arith.cmpi ne, %5, %6 : vector<16x128xi32>
    %c0_i32_1 = arith.constant 0 : i32
    %8 = vector.broadcast %c0_i32_1 : i32 to vector<16x128xi32>
    %9 = arith.cmpi slt, %5, %8 : vector<16x128xi32>
    %c0_i32_2 = arith.constant 0 : i32
    %10 = arith.cmpi slt, %3, %c0_i32_2 : i32
    %11 = vector.broadcast %10 : i1 to vector<16x128xi1>
    %12 = vector.broadcast %11 : vector<16x128xi1> to vector<16x128xi1>
    %13 = arith.xori %9, %12 : vector<16x128xi1>
    %14 = arith.andi %13, %7 : vector<16x128xi1>
    %15 = vector.broadcast %3 : i32 to vector<16x128xi32>
    %16 = arith.addi %5, %15 : vector<16x128xi32>
    %17 = arith.select %14, %16, %5 : vector<16x128xi1>, vector<16x128xi32>
    %c0 = arith.constant 0 : index
    %c0_3 = arith.constant 0 : index
    %18 = vector.load %arg0[%c0, %c0_3] : memref<16x128xf32, #tpu.memory_space<vmem>>, vector<16x128xf32>
    %c1_i32_4 = arith.constant 1 : i32
    %19 = vector.broadcast %c1_i32_4 : i32 to vector<16x128xi32>
    %20 = arith.cmpi sge, %17, %19 : vector<16x128xi32>
    %c1_i32_5 = arith.constant 1 : i32
    %21 = tpu.dynamic_rotate %18 by %c1_i32_5 dim 1 : vector<16x128xf32>, i32 -> vector<16x128xf32>
    %cst = arith.constant 0xFF800000 : f32
    %22 = vector.broadcast %cst : f32 to vector<16x128xf32>
    %23 = arith.select %20, %21, %22 : vector<16x128xi1>, vector<16x128xf32>
    %c14_i32 = arith.constant 14 : i32
    %24 = vector.broadcast %c14_i32 : i32 to vector<16x128xi32>
    %25 = arith.cmpi sle, %17, %24 : vector<16x128xi32>
    %c127_i32 = arith.constant 127 : i32
    %26 = tpu.dynamic_rotate %18 by %c127_i32 dim 1 : vector<16x128xf32>, i32 -> vector<16x128xf32>
    %cst_6 = arith.constant 0xFF800000 : f32
    %27 = vector.broadcast %cst_6 : f32 to vector<16x128xf32>
    %28 = arith.select %25, %26, %27 : vector<16x128xi1>, vector<16x128xf32>
    %29 = arith.maximumf %23, %28 : vector<16x128xf32>
    %30 = arith.maximumf %18, %29 : vector<16x128xf32>
    %c1_i32_7 = arith.constant 1 : i32
    %31 = vector.broadcast %c1_i32_7 : i32 to vector<16x128xi32>
    %32 = arith.cmpi sge, %0, %31 : vector<16x128xi32>
    %c1_i32_8 = arith.constant 1 : i32
    %33 = tpu.dynamic_rotate %30 by %c1_i32_8 dim 0 : vector<16x128xf32>, i32 -> vector<16x128xf32>
    %cst_9 = arith.constant 0xFF800000 : f32
    %34 = vector.broadcast %cst_9 : f32 to vector<16x128xf32>
    %35 = arith.select %32, %33, %34 : vector<16x128xi1>, vector<16x128xf32>
    %c14_i32_10 = arith.constant 14 : i32
    %36 = vector.broadcast %c14_i32_10 : i32 to vector<16x128xi32>
    %37 = arith.cmpi sle, %0, %36 : vector<16x128xi32>
    %c15_i32 = arith.constant 15 : i32
    %38 = tpu.dynamic_rotate %30 by %c15_i32 dim 0 : vector<16x128xf32>, i32 -> vector<16x128xf32>
    %cst_11 = arith.constant 0xFF800000 : f32
    %39 = vector.broadcast %cst_11 : f32 to vector<16x128xf32>
    %40 = arith.select %37, %38, %39 : vector<16x128xi1>, vector<16x128xf32>
    %41 = arith.maximumf %35, %40 : vector<16x128xf32>
    %42 = arith.maximumf %30, %41 : vector<16x128xf32>
    %43 = arith.cmpf oeq, %42, %18 : vector<16x128xf32>
    %cst_12 = arith.constant 0.000000e+00 : f32
    %44 = vector.broadcast %cst_12 : f32 to vector<16x128xf32>
    %45 = arith.select %43, %18, %44 : vector<16x128xi1>, vector<16x128xf32>
    %c0_13 = arith.constant 0 : index
    %c0_14 = arith.constant 0 : index
    %46 = vector.load %arg1[%c0_13, %c0_14] : memref<16x128xf32, #tpu.memory_space<vmem>>, vector<16x128xf32>
    tpu.vector_store %arg1[%c0_13, %c0_14], %45 {strides = array<i32>} : memref<16x128xf32, #tpu.memory_space<vmem>>, vector<16x128xf32>,
    return
  }
}

module attributes {stable_mosaic.version = 11 : i64} {
  func.func @_decode_kernel(%arg0: memref<38x128xf32, #tpu.memory_space<vmem>>, %arg1: memref<2xf32, #tpu.memory_space<smem>>, %arg2: memref<9xf32, #tpu.memory_space<smem>>, %arg3: memref<2xf32, #tpu.memory_space<smem>>, %arg4: memref<14x128xf32, #tpu.memory_space<vmem>>) attributes {dimension_semantics = [], scalar_prefetch = 0 : i64, scratch_operands = 0 : i64, tpu.core_type = #tpu.core_type<tc>} {
    %c0 = arith.constant 0 : index
    %c0_0 = arith.constant 0 : index
    %0 = vector.load %arg0[%c0, %c0_0] : memref<38x128xf32, #tpu.memory_space<vmem>>, vector<1x128xf32>
    %c1 = arith.constant 1 : index
    %c0_1 = arith.constant 0 : index
    %1 = vector.load %arg0[%c1, %c0_1] : memref<38x128xf32, #tpu.memory_space<vmem>>, vector<1x128xf32>
    %c2 = arith.constant 2 : index
    %c0_2 = arith.constant 0 : index
    %2 = vector.load %arg0[%c2, %c0_2] : memref<38x128xf32, #tpu.memory_space<vmem>>, vector<1x128xf32>
    %c3 = arith.constant 3 : index
    %c0_3 = arith.constant 0 : index
    %3 = vector.load %arg0[%c3, %c0_3] : memref<38x128xf32, #tpu.memory_space<vmem>>, vector<1x128xf32>
    %c1_4 = arith.constant 1 : index
    %4 = memref.load %arg1[%c1_4] : memref<2xf32, #tpu.memory_space<smem>>
    %5 = vector.broadcast %4 : f32 to vector<1x128xf32>
    %6 = arith.mulf %3, %5 : vector<1x128xf32>
    %c0_5 = arith.constant 0 : index
    %7 = memref.load %arg1[%c0_5] : memref<2xf32, #tpu.memory_space<smem>>
    %8 = vector.broadcast %7 : f32 to vector<1x128xf32>
    %9 = arith.addf %6, %8 : vector<1x128xf32>
    %c4 = arith.constant 4 : index
    %c0_6 = arith.constant 0 : index
    %10 = vector.load %arg0[%c4, %c0_6] : memref<38x128xf32, #tpu.memory_space<vmem>>, vector<1x128xf32>
    %11 = arith.addf %0, %10 : vector<1x128xf32>
    %c5 = arith.constant 5 : index
    %c0_7 = arith.constant 0 : index
    %12 = vector.load %arg0[%c5, %c0_7] : memref<38x128xf32, #tpu.memory_space<vmem>>, vector<1x128xf32>
    %13 = arith.addf %1, %12 : vector<1x128xf32>
    %c20 = arith.constant 20 : index
    %c0_8 = arith.constant 0 : index
    %14 = vector.load %arg0[%c20, %c0_8] : memref<38x128xf32, #tpu.memory_space<vmem>>, vector<1x128xf32>
    %15 = arith.mulf %14, %11 : vector<1x128xf32>
    %c21 = arith.constant 21 : index
    %c0_9 = arith.constant 0 : index
    %16 = vector.load %arg0[%c21, %c0_9] : memref<38x128xf32, #tpu.memory_space<vmem>>, vector<1x128xf32>
    %17 = arith.mulf %16, %13 : vector<1x128xf32>
    %18 = arith.addf %15, %17 : vector<1x128xf32>
    %c22 = arith.constant 22 : index
    %c0_10 = arith.constant 0 : index
    %19 = vector.load %arg0[%c22, %c0_10] : memref<38x128xf32, #tpu.memory_space<vmem>>, vector<1x128xf32>
    %20 = arith.addf %18, %19 : vector<1x128xf32>
    %c23 = arith.constant 23 : index
    %c0_11 = arith.constant 0 : index
    %21 = vector.load %arg0[%c23, %c0_11] : memref<38x128xf32, #tpu.memory_space<vmem>>, vector<1x128xf32>
    %22 = arith.mulf %21, %11 : vector<1x128xf32>
    %c24 = arith.constant 24 : index
    %c0_12 = arith.constant 0 : index
    %23 = vector.load %arg0[%c24, %c0_12] : memref<38x128xf32, #tpu.memory_space<vmem>>, vector<1x128xf32>
    %24 = arith.mulf %23, %13 : vector<1x128xf32>
    %25 = arith.addf %22, %24 : vector<1x128xf32>
    %c25 = arith.constant 25 : index
    %c0_13 = arith.constant 0 : index
    %26 = vector.load %arg0[%c25, %c0_13] : memref<38x128xf32, #tpu.memory_space<vmem>>, vector<1x128xf32>
    %27 = arith.addf %25, %26 : vector<1x128xf32>
    %c26 = arith.constant 26 : index
    %c0_14 = arith.constant 0 : index
    %28 = vector.load %arg0[%c26, %c0_14] : memref<38x128xf32, #tpu.memory_space<vmem>>, vector<1x128xf32>
    %29 = arith.mulf %28, %11 : vector<1x128xf32>
    %c27 = arith.constant 27 : index
    %c0_15 = arith.constant 0 : index
    %30 = vector.load %arg0[%c27, %c0_15] : memref<38x128xf32, #tpu.memory_space<vmem>>, vector<1x128xf32>
    %31 = arith.mulf %30, %13 : vector<1x128xf32>
    %32 = arith.addf %29, %31 : vector<1x128xf32>
    %c28 = arith.constant 28 : index
    %c0_16 = arith.constant 0 : index
    %33 = vector.load %arg0[%c28, %c0_16] : memref<38x128xf32, #tpu.memory_space<vmem>>, vector<1x128xf32>
    %34 = arith.addf %32, %33 : vector<1x128xf32>
    %35 = arith.mulf %20, %9 : vector<1x128xf32>
    %36 = arith.mulf %27, %9 : vector<1x128xf32>
    %37 = arith.mulf %34, %9 : vector<1x128xf32>
    %c11 = arith.constant 11 : index
    %c0_17 = arith.constant 0 : index
    %38 = vector.load %arg0[%c11, %c0_17] : memref<38x128xf32, #tpu.memory_space<vmem>>, vector<1x128xf32>
    %39 = arith.mulf %38, %35 : vector<1x128xf32>
    %c12 = arith.constant 12 : index
    %c0_18 = arith.constant 0 : index
    %40 = vector.load %arg0[%c12, %c0_18] : memref<38x128xf32, #tpu.memory_space<vmem>>, vector<1x128xf32>
    %41 = arith.mulf %40, %36 : vector<1x128xf32>
    %42 = arith.addf %39, %41 : vector<1x128xf32>
    %c13 = arith.constant 13 : index
    %c0_19 = arith.constant 0 : index
    %43 = vector.load %arg0[%c13, %c0_19] : memref<38x128xf32, #tpu.memory_space<vmem>>, vector<1x128xf32>
    %44 = arith.mulf %43, %37 : vector<1x128xf32>
    %45 = arith.addf %42, %44 : vector<1x128xf32>
    %c14 = arith.constant 14 : index
    %c0_20 = arith.constant 0 : index
    %46 = vector.load %arg0[%c14, %c0_20] : memref<38x128xf32, #tpu.memory_space<vmem>>, vector<1x128xf32>
    %47 = arith.mulf %46, %35 : vector<1x128xf32>
    %c15 = arith.constant 15 : index
    %c0_21 = arith.constant 0 : index
    %48 = vector.load %arg0[%c15, %c0_21] : memref<38x128xf32, #tpu.memory_space<vmem>>, vector<1x128xf32>
    %49 = arith.mulf %48, %36 : vector<1x128xf32>
    %50 = arith.addf %47, %49 : vector<1x128xf32>
    %c16 = arith.constant 16 : index
    %c0_22 = arith.constant 0 : index
    %51 = vector.load %arg0[%c16, %c0_22] : memref<38x128xf32, #tpu.memory_space<vmem>>, vector<1x128xf32>
    %52 = arith.mulf %51, %37 : vector<1x128xf32>
    %53 = arith.addf %50, %52 : vector<1x128xf32>
    %c17 = arith.constant 17 : index
    %c0_23 = arith.constant 0 : index
    %54 = vector.load %arg0[%c17, %c0_23] : memref<38x128xf32, #tpu.memory_space<vmem>>, vector<1x128xf32>
    %55 = arith.mulf %54, %35 : vector<1x128xf32>
    %c18 = arith.constant 18 : index
    %c0_24 = arith.constant 0 : index
    %56 = vector.load %arg0[%c18, %c0_24] : memref<38x128xf32, #tpu.memory_space<vmem>>, vector<1x128xf32>
    %57 = arith.mulf %56, %36 : vector<1x128xf32>
    %58 = arith.addf %55, %57 : vector<1x128xf32>
    %c19 = arith.constant 19 : index
    %c0_25 = arith.constant 0 : index
    %59 = vector.load %arg0[%c19, %c0_25] : memref<38x128xf32, #tpu.memory_space<vmem>>, vector<1x128xf32>
    %60 = arith.mulf %59, %37 : vector<1x128xf32>
    %61 = arith.addf %58, %60 : vector<1x128xf32>
    %cst = arith.constant 0.000000e+00 : f32
    %62 = vector.broadcast %cst : f32 to vector<1x128xf32>
    %cst_26 = arith.constant 0.000000e+00 : f32
    %63 = vector.broadcast %cst_26 : f32 to vector<1x128xf32>
    %cst_27 = arith.constant 0.000000e+00 : f32
    %64 = vector.broadcast %cst_27 : f32 to vector<1x128xf32>
    %cst_28 = arith.constant 0.000000e+00 : f32
    %65 = vector.broadcast %cst_28 : f32 to vector<1x128xf32>
    %66 = arith.cmpf oeq, %2, %65 : vector<1x128xf32>
    %c0_29 = arith.constant 0 : index
    %67 = memref.load %arg2[%c0_29] : memref<9xf32, #tpu.memory_space<smem>>
    %68 = vector.broadcast %67 : f32 to vector<1x128xf32>
    %69 = arith.select %66, %68, %62 : vector<1x128xi1>, vector<1x128xf32>
    %c1_30 = arith.constant 1 : index
    %70 = memref.load %arg2[%c1_30] : memref<9xf32, #tpu.memory_space<smem>>
    %71 = vector.broadcast %70 : f32 to vector<1x128xf32>
    %72 = arith.select %66, %71, %63 : vector<1x128xi1>, vector<1x128xf32>
    %c2_31 = arith.constant 2 : index
    %73 = memref.load %arg2[%c2_31] : memref<9xf32, #tpu.memory_space<smem>>
    %74 = vector.broadcast %73 : f32 to vector<1x128xf32>
    %75 = arith.select %66, %74, %64 : vector<1x128xi1>, vector<1x128xf32>
    %cst_32 = arith.constant 1.000000e+00 : f32
    %76 = vector.broadcast %cst_32 : f32 to vector<1x128xf32>
    %77 = arith.cmpf oeq, %2, %76 : vector<1x128xf32>
    %c3_33 = arith.constant 3 : index
    %78 = memref.load %arg2[%c3_33] : memref<9xf32, #tpu.memory_space<smem>>
    %79 = vector.broadcast %78 : f32 to vector<1x128xf32>
    %80 = arith.select %77, %79, %69 : vector<1x128xi1>, vector<1x128xf32>
    %c4_34 = arith.constant 4 : index
    %81 = memref.load %arg2[%c4_34] : memref<9xf32, #tpu.memory_space<smem>>
    %82 = vector.broadcast %81 : f32 to vector<1x128xf32>
    %83 = arith.select %77, %82, %72 : vector<1x128xi1>, vector<1x128xf32>
    %c5_35 = arith.constant 5 : index
    %84 = memref.load %arg2[%c5_35] : memref<9xf32, #tpu.memory_space<smem>>
    %85 = vector.broadcast %84 : f32 to vector<1x128xf32>
    %86 = arith.select %77, %85, %75 : vector<1x128xi1>, vector<1x128xf32>
    %cst_36 = arith.constant 2.000000e+00 : f32
    %87 = vector.broadcast %cst_36 : f32 to vector<1x128xf32>
    %88 = arith.cmpf oeq, %2, %87 : vector<1x128xf32>
    %c6 = arith.constant 6 : index
    %89 = memref.load %arg2[%c6] : memref<9xf32, #tpu.memory_space<smem>>
    %90 = vector.broadcast %89 : f32 to vector<1x128xf32>
    %91 = arith.select %88, %90, %80 : vector<1x128xi1>, vector<1x128xf32>
    %c7 = arith.constant 7 : index
    %92 = memref.load %arg2[%c7] : memref<9xf32, #tpu.memory_space<smem>>
    %93 = vector.broadcast %92 : f32 to vector<1x128xf32>
    %94 = arith.select %88, %93, %83 : vector<1x128xi1>, vector<1x128xf32>
    %c8 = arith.constant 8 : index
    %95 = memref.load %arg2[%c8] : memref<9xf32, #tpu.memory_space<smem>>
    %96 = vector.broadcast %95 : f32 to vector<1x128xf32>
    %97 = arith.select %88, %96, %86 : vector<1x128xi1>, vector<1x128xf32>
    %c6_37 = arith.constant 6 : index
    %c0_38 = arith.constant 0 : index
    %98 = vector.load %arg0[%c6_37, %c0_38] : memref<38x128xf32, #tpu.memory_space<vmem>>, vector<1x128xf32>
    %99 = math.exp %98 : vector<1x128xf32>
    %100 = arith.mulf %99, %91 : vector<1x128xf32>
    %c7_39 = arith.constant 7 : index
    %c0_40 = arith.constant 0 : index
    %101 = vector.load %arg0[%c7_39, %c0_40] : memref<38x128xf32, #tpu.memory_space<vmem>>, vector<1x128xf32>
    %102 = math.exp %101 : vector<1x128xf32>
    %103 = arith.mulf %102, %94 : vector<1x128xf32>
    %c8_41 = arith.constant 8 : index
    %c0_42 = arith.constant 0 : index
    %104 = vector.load %arg0[%c8_41, %c0_42] : memref<38x128xf32, #tpu.memory_space<vmem>>, vector<1x128xf32>
    %105 = math.exp %104 : vector<1x128xf32>
    %106 = arith.mulf %105, %97 : vector<1x128xf32>
    %cst_43 = arith.constant 5.000000e-01 : f32
    %107 = vector.broadcast %cst_43 : f32 to vector<1x128xf32>
    %108 = arith.mulf %107, %103 : vector<1x128xf32>
    %109 = arith.addf %53, %108 : vector<1x128xf32>
    %c9 = arith.constant 9 : index
    %c0_44 = arith.constant 0 : index
    %110 = vector.load %arg0[%c9, %c0_44] : memref<38x128xf32, #tpu.memory_space<vmem>>, vector<1x128xf32>
    %c10 = arith.constant 10 : index
    %c0_45 = arith.constant 0 : index
    %111 = vector.load %arg0[%c10, %c0_45] : memref<38x128xf32, #tpu.memory_space<vmem>>, vector<1x128xf32>
    %cst_46 = arith.constant 1.000000e-07 : f32
    %112 = vector.broadcast %cst_46 : f32 to vector<1x128xf32>
    %113 = arith.addf %111, %112 : vector<1x128xf32>
    %114 = arith.mulf %110, %110 : vector<1x128xf32>
    %115 = arith.mulf %113, %113 : vector<1x128xf32>
    %116 = arith.addf %114, %115 : vector<1x128xf32>
    %117 = math.rsqrt %116 : vector<1x128xf32>
    %cst_47 = arith.constant 0.000000e+00 : f32
    %118 = vector.broadcast %cst_47 : f32 to vector<1x128xf32>
    %119 = arith.cmpf oge, %113, %118 : vector<1x128xf32>
    %cst_48 = arith.constant 1.000000e+00 : f32
    %cst_49 = arith.constant -1.000000e+00 : f32
    %120 = vector.broadcast %cst_48 : f32 to vector<1x128xf32>
    %121 = vector.broadcast %cst_49 : f32 to vector<1x128xf32>
    %122 = arith.select %119, %120, %121 : vector<1x128xi1>, vector<1x128xf32>
    %123 = arith.mulf %110, %122 : vector<1x128xf32>
    %124 = arith.mulf %123, %117 : vector<1x128xf32>
    %125 = math.absf %113 : vector<1x128xf32>
    %126 = arith.mulf %125, %117 : vector<1x128xf32>
    %cst_50 = arith.constant 0.000000e+00 : f32
    %127 = vector.broadcast %cst_50 : f32 to vector<1x128xf32>
    %128 = arith.cmpf oge, %111, %127 : vector<1x128xf32>
    %cst_51 = arith.constant 0.000000e+00 : f32
    %129 = vector.broadcast %cst_51 : f32 to vector<1x128xf32>
    %130 = arith.subf %129, %124 : vector<1x128xf32>
    %131 = arith.select %128, %124, %130 : vector<1x128xi1>, vector<1x128xf32>
    %cst_52 = arith.constant 0.000000e+00 : f32
    %132 = vector.broadcast %cst_52 : f32 to vector<1x128xf32>
    %133 = arith.subf %132, %126 : vector<1x128xf32>
    %134 = arith.select %128, %133, %126 : vector<1x128xi1>, vector<1x128xf32>
    %cst_53 = arith.constant 1.000000e-07 : f32
    %135 = vector.broadcast %cst_53 : f32 to vector<1x128xf32>
    %136 = arith.addf %61, %135 : vector<1x128xf32>
    %137 = arith.mulf %45, %45 : vector<1x128xf32>
    %138 = arith.mulf %136, %136 : vector<1x128xf32>
    %139 = arith.addf %137, %138 : vector<1x128xf32>
    %140 = math.rsqrt %139 : vector<1x128xf32>
    %cst_54 = arith.constant 0.000000e+00 : f32
    %141 = vector.broadcast %cst_54 : f32 to vector<1x128xf32>
    %142 = arith.cmpf oge, %136, %141 : vector<1x128xf32>
    %cst_55 = arith.constant 1.000000e+00 : f32
    %cst_56 = arith.constant -1.000000e+00 : f32
    %143 = vector.broadcast %cst_55 : f32 to vector<1x128xf32>
    %144 = vector.broadcast %cst_56 : f32 to vector<1x128xf32>
    %145 = arith.select %142, %143, %144 : vector<1x128xi1>, vector<1x128xf32>
    %146 = arith.mulf %45, %145 : vector<1x128xf32>
    %147 = arith.mulf %146, %140 : vector<1x128xf32>
    %148 = math.absf %136 : vector<1x128xf32>
    %149 = arith.mulf %148, %140 : vector<1x128xf32>
    %150 = arith.mulf %131, %149 : vector<1x128xf32>
    %151 = arith.mulf %134, %147 : vector<1x128xf32>
    %152 = arith.subf %150, %151 : vector<1x128xf32>
    %153 = arith.mulf %134, %149 : vector<1x128xf32>
    %154 = arith.mulf %131, %147 : vector<1x128xf32>
    %155 = arith.addf %153, %154 : vector<1x128xf32>
    %c29 = arith.constant 29 : index
    %c0_57 = arith.constant 0 : index
    %156 = vector.load %arg0[%c29, %c0_57] : memref<38x128xf32, #tpu.memory_space<vmem>>, vector<1x128xf32>
    %c30 = arith.constant 30 : index
    %c0_58 = arith.constant 0 : index
    %157 = vector.load %arg0[%c30, %c0_58] : memref<38x128xf32, #tpu.memory_space<vmem>>, vector<1x128xf32>
    %c31 = arith.constant 31 : index
    %c0_59 = arith.constant 0 : index
    %158 = vector.load %arg0[%c31, %c0_59] : memref<38x128xf32, #tpu.memory_space<vmem>>, vector<1x128xf32>
    %c32 = arith.constant 32 : index
    %c0_60 = arith.constant 0 : index
    %159 = vector.load %arg0[%c32, %c0_60] : memref<38x128xf32, #tpu.memory_space<vmem>>, vector<1x128xf32>
    %c33 = arith.constant 33 : index
    %c0_61 = arith.constant 0 : index
    %160 = vector.load %arg0[%c33, %c0_61] : memref<38x128xf32, #tpu.memory_space<vmem>>, vector<1x128xf32>
    %c34 = arith.constant 34 : index
    %c0_62 = arith.constant 0 : index
    %161 = vector.load %arg0[%c34, %c0_62] : memref<38x128xf32, #tpu.memory_space<vmem>>, vector<1x128xf32>
    %c35 = arith.constant 35 : index
    %c0_63 = arith.constant 0 : index
    %162 = vector.load %arg0[%c35, %c0_63] : memref<38x128xf32, #tpu.memory_space<vmem>>, vector<1x128xf32>
    %c36 = arith.constant 36 : index
    %c0_64 = arith.constant 0 : index
    %163 = vector.load %arg0[%c36, %c0_64] : memref<38x128xf32, #tpu.memory_space<vmem>>, vector<1x128xf32>
    %c37 = arith.constant 37 : index
    %c0_65 = arith.constant 0 : index
    %164 = vector.load %arg0[%c37, %c0_65] : memref<38x128xf32, #tpu.memory_space<vmem>>, vector<1x128xf32>
    %165 = tpu.iota {dimensions = array<i32: 0>} : vector<8x128xi32>
    %c1_i32 = arith.constant 1 : i32
    %166 = vector.broadcast %c1_i32 : i32 to vector<8x128xi32>
    %167 = arith.cmpi sge, %165, %166 : vector<8x128xi32>
    %c4_i32 = arith.constant 4 : i32
    %168 = vector.broadcast %c4_i32 : i32 to vector<8x128xi32>
    %169 = arith.cmpi sle, %165, %168 : vector<8x128xi32>
    %170 = arith.andi %167, %169 : vector<8x128xi1>
    %cst_66 = arith.constant 5.000000e-01 : f32
    %cst_67 = arith.constant -5.000000e-01 : f32
    %171 = vector.broadcast %cst_66 : f32 to vector<8x128xf32>
    %172 = vector.broadcast %cst_67 : f32 to vector<8x128xf32>
    %173 = arith.select %170, %171, %172 : vector<8x128xi1>, vector<8x128xf32>
    %c4_i32_68 = arith.constant 4 : i32
    %c0_i32 = arith.constant 0 : i32
    %174 = arith.cmpi eq, %c4_i32_68, %c0_i32 : i32
    %c1_i32_69 = arith.constant 1 : i32
    %175 = arith.select %174, %c1_i32_69, %c4_i32_68 : i32
    %176 = vector.broadcast %175 : i32 to vector<8x128xi32>
    %177 = arith.remsi %165, %176 : vector<8x128xi32>
    %c0_i32_70 = arith.constant 0 : i32
    %178 = vector.broadcast %c0_i32_70 : i32 to vector<8x128xi32>
    %179 = arith.cmpi ne, %177, %178 : vector<8x128xi32>
    %c0_i32_71 = arith.constant 0 : i32
    %180 = vector.broadcast %c0_i32_71 : i32 to vector<8x128xi32>
    %181 = arith.cmpi slt, %177, %180 : vector<8x128xi32>
    %c0_i32_72 = arith.constant 0 : i32
    %182 = arith.cmpi slt, %175, %c0_i32_72 : i32
    %183 = vector.broadcast %182 : i1 to vector<8x128xi1>
    %184 = vector.broadcast %183 : vector<8x128xi1> to vector<8x128xi1>
    %185 = arith.xori %181, %184 : vector<8x128xi1>
    %186 = arith.andi %185, %179 : vector<8x128xi1>
    %187 = vector.broadcast %175 : i32 to vector<8x128xi32>
    %188 = arith.addi %177, %187 : vector<8x128xi32>
    %189 = arith.select %186, %188, %177 : vector<8x128xi1>, vector<8x128xi32>
    %c1_i32_73 = arith.constant 1 : i32
    %190 = vector.broadcast %c1_i32_73 : i32 to vector<8x128xi32>
    %191 = arith.cmpi sle, %189, %190 : vector<8x128xi32>
    %cst_74 = arith.constant -1.000000e+00 : f32
    %cst_75 = arith.constant 0.000000e+00 : f32
    %192 = vector.broadcast %cst_74 : f32 to vector<8x128xf32>
    %193 = vector.broadcast %cst_75 : f32 to vector<8x128xf32>
    %194 = arith.select %191, %192, %193 : vector<8x128xi1>, vector<8x128xf32>
    %c3_i32 = arith.constant 3 : i32
    %195 = vector.broadcast %c3_i32 : i32 to vector<8x128xi32>
    %196 = arith.cmpi sge, %165, %195 : vector<8x128xi32>
    %c6_i32 = arith.constant 6 : i32
    %197 = vector.broadcast %c6_i32 : i32 to vector<8x128xi32>
    %198 = arith.cmpi sle, %165, %197 : vector<8x128xi32>
    %199 = arith.andi %196, %198 : vector<8x128xi1>
    %cst_76 = arith.constant 5.000000e-01 : f32
    %cst_77 = arith.constant -5.000000e-01 : f32
    %200 = vector.broadcast %cst_76 : f32 to vector<8x128xf32>
    %201 = vector.broadcast %cst_77 : f32 to vector<8x128xf32>
    %202 = arith.select %199, %200, %201 : vector<8x128xi1>, vector<8x128xf32>
    %203 = vector.broadcast %100 : vector<1x128xf32> to vector<8x128xf32>
    %204 = arith.mulf %173, %203 : vector<8x128xf32>
    %205 = vector.broadcast %103 : vector<1x128xf32> to vector<8x128xf32>
    %206 = arith.mulf %194, %205 : vector<8x128xf32>
    %207 = vector.broadcast %106 : vector<1x128xf32> to vector<8x128xf32>
    %208 = arith.mulf %202, %207 : vector<8x128xf32>
    %209 = vector.broadcast %152 : vector<1x128xf32> to vector<8x128xf32>
    %210 = arith.mulf %209, %204 : vector<8x128xf32>
    %211 = vector.broadcast %155 : vector<1x128xf32> to vector<8x128xf32>
    %212 = arith.mulf %211, %208 : vector<8x128xf32>
    %213 = arith.addf %210, %212 : vector<8x128xf32>
    %214 = vector.broadcast %45 : vector<1x128xf32> to vector<8x128xf32>
    %215 = arith.addf %213, %214 : vector<8x128xf32>
    %216 = vector.broadcast %109 : vector<1x128xf32> to vector<8x128xf32>
    %217 = arith.addf %206, %216 : vector<8x128xf32>
    %cst_78 = arith.constant 0.000000e+00 : f32
    %218 = vector.broadcast %cst_78 : f32 to vector<1x128xf32>
    %219 = arith.subf %218, %155 : vector<1x128xf32>
    %220 = vector.broadcast %219 : vector<1x128xf32> to vector<8x128xf32>
    %221 = arith.mulf %220, %204 : vector<8x128xf32>
    %222 = vector.broadcast %152 : vector<1x128xf32> to vector<8x128xf32>
    %223 = arith.mulf %222, %208 : vector<8x128xf32>
    %224 = arith.addf %221, %223 : vector<8x128xf32>
    %225 = vector.broadcast %61 : vector<1x128xf32> to vector<8x128xf32>
    %226 = arith.addf %224, %225 : vector<8x128xf32>
    %227 = vector.broadcast %162 : vector<1x128xf32> to vector<8x128xf32>
    %228 = arith.mulf %227, %215 : vector<8x128xf32>
    %229 = vector.broadcast %163 : vector<1x128xf32> to vector<8x128xf32>
    %230 = arith.mulf %229, %217 : vector<8x128xf32>
    %231 = arith.addf %228, %230 : vector<8x128xf32>
    %232 = vector.broadcast %164 : vector<1x128xf32> to vector<8x128xf32>
    %233 = arith.mulf %232, %226 : vector<8x128xf32>
    %234 = arith.addf %231, %233 : vector<8x128xf32>
    %235 = tpu.reciprocal %234 : vector<8x128xf32> -> vector<8x128xf32>
    %236 = vector.broadcast %156 : vector<1x128xf32> to vector<8x128xf32>
    %237 = arith.mulf %236, %215 : vector<8x128xf32>
    %238 = vector.broadcast %157 : vector<1x128xf32> to vector<8x128xf32>
    %239 = arith.mulf %238, %217 : vector<8x128xf32>
    %240 = arith.addf %237, %239 : vector<8x128xf32>
    %241 = vector.broadcast %158 : vector<1x128xf32> to vector<8x128xf32>
    %242 = arith.mulf %241, %226 : vector<8x128xf32>
    %243 = arith.addf %240, %242 : vector<8x128xf32>
    %244 = arith.mulf %243, %235 : vector<8x128xf32>
    %245 = vector.broadcast %159 : vector<1x128xf32> to vector<8x128xf32>
    %246 = arith.mulf %245, %215 : vector<8x128xf32>
    %247 = vector.broadcast %160 : vector<1x128xf32> to vector<8x128xf32>
    %248 = arith.mulf %247, %217 : vector<8x128xf32>
    %249 = arith.addf %246, %248 : vector<8x128xf32>
    %250 = vector.broadcast %161 : vector<1x128xf32> to vector<8x128xf32>
    %251 = arith.mulf %250, %226 : vector<8x128xf32>
    %252 = arith.addf %249, %251 : vector<8x128xf32>
    %253 = arith.mulf %252, %235 : vector<8x128xf32>
    %cst_79 = arith.constant dense<0x7F800000> : vector<128xf32>
    %254 = vector.multi_reduction <minimumf>, %244, %cst_79 [0] : vector<8x128xf32> to vector<128xf32>
    %255 = vector.shape_cast %254 : vector<128xf32> to vector<1x128xf32>
    %cst_80 = arith.constant dense<0xFF800000> : vector<128xf32>
    %256 = vector.multi_reduction <maximumf>, %244, %cst_80 [0] : vector<8x128xf32> to vector<128xf32>
    %257 = vector.shape_cast %256 : vector<128xf32> to vector<1x128xf32>
    %cst_81 = arith.constant dense<0x7F800000> : vector<128xf32>
    %258 = vector.multi_reduction <minimumf>, %253, %cst_81 [0] : vector<8x128xf32> to vector<128xf32>
    %259 = vector.shape_cast %258 : vector<128xf32> to vector<1x128xf32>
    %cst_82 = arith.constant dense<0xFF800000> : vector<128xf32>
    %260 = vector.multi_reduction <maximumf>, %253, %cst_82 [0] : vector<8x128xf32> to vector<128xf32>
    %261 = vector.shape_cast %260 : vector<128xf32> to vector<1x128xf32>
    %c0_83 = arith.constant 0 : index
    %262 = memref.load %arg3[%c0_83] : memref<2xf32, #tpu.memory_space<smem>>
    %c1_84 = arith.constant 1 : index
    %263 = memref.load %arg3[%c1_84] : memref<2xf32, #tpu.memory_space<smem>>
    %cst_85 = arith.constant 0.000000e+00 : f32
    %264 = vector.broadcast %cst_85 : f32 to vector<1x128xf32>
    %265 = arith.maximumf %264, %255 : vector<1x128xf32>
    %266 = vector.broadcast %262 : f32 to vector<1x128xf32>
    %267 = arith.minimumf %266, %265 : vector<1x128xf32>
    %cst_86 = arith.constant 0.000000e+00 : f32
    %268 = vector.broadcast %cst_86 : f32 to vector<1x128xf32>
    %269 = arith.maximumf %268, %259 : vector<1x128xf32>
    %270 = vector.broadcast %263 : f32 to vector<1x128xf32>
    %271 = arith.minimumf %270, %269 : vector<1x128xf32>
    %cst_87 = arith.constant 0.000000e+00 : f32
    %272 = vector.broadcast %cst_87 : f32 to vector<1x128xf32>
    %273 = arith.maximumf %272, %257 : vector<1x128xf32>
    %274 = vector.broadcast %262 : f32 to vector<1x128xf32>
    %275 = arith.minimumf %274, %273 : vector<1x128xf32>
    %cst_88 = arith.constant 0.000000e+00 : f32
    %276 = vector.broadcast %cst_88 : f32 to vector<1x128xf32>
    %277 = arith.maximumf %276, %261 : vector<1x128xf32>
    %278 = vector.broadcast %263 : f32 to vector<1x128xf32>
    %279 = arith.minimumf %278, %277 : vector<1x128xf32>
    %280 = tpu.concatenate %267, %271, %275, %279, %103, %106, %100, %45, %109, %61, %134, %131, %155, %152 in 0 : vector<1x128xf32>, vector<1x128xf32>, vector<1x128xf32>, vector<1x128xf32>, vector<1x128xf32>, vector<1x128xf32>, vector<1x128xf32>, vector<1x128xf32>, vector<1x128xf32>, vector<1x128xf32>, vector<1x128xf32>, vector<1x128xf32>, vector<1x128xf32>, vector<1x128xf32> -> vector<14x128xf32>
    %c0_89 = arith.constant 0 : index
    %c0_90 = arith.constant 0 : index
    %281 = vector.load %arg4[%c0_89, %c0_90] : memref<14x128xf32, #tpu.memory_space<vmem>>, vector<14x128xf32>
    tpu.vector_store %arg4[%c0_89, %c0_90], %280 {strides = array<i32>} : memref<14x128xf32, #tpu.memory_space<vmem>>, vector<14x128xf32>,
    return
  }
}

</mosaic_0001>

<bundles_post_ra>
// kernel: post_process_forward.2
= control target key start
LH: loop header
LB: loop body
LE: loop exit
PB: predicated region body
PF: predicated region fallthrough
CT: control target
= control target key end

     0   :  { %s79_s8 = smov 127   ;;  %s80_s9 = smov 1   ;;  %v8_v2 = vlaneseq  ;;  %s103_s0 = inlined_call_operand.vmem [shape: f32[16,128], index: 0, kind: input, shape index: {}]   ;;  %s104_s1 = inlined_call_operand.vmem [shape: f32[16,128], index: 1, kind: output, shape index: {}]  }
   0x1   :  { %v25_v0 = vld [vmem:[%s103_s0] sm:$0xff]  ;;  %v26_v1 = vld [vmem:[%s103_s0 + $0x8] sm:$0xff] }
   0x2   :  { %35 = vrot.lane.b32.xlu1 %v25_v0, %s79_s8  ;;  %28 = vrot.lane.b32.xlu0 %v25_v0, %s80_s9  ;;  %v12_v3 = vand.u32 127, %v8_v2  ;;  %v9_v7 = vshrl.u32 %v8_v2, 7 }
   0x4   :  { %v17_v4 = vand.u32 15, %v12_v3  ;;  %v10_v14 = vadd.s32 8, %v9_v7  ;;  %vm45_vm2 = vcmp.ge.s32.totalorder %v9_v7, 1  ;;  %vm49_vm3 = vcmp.lt.s32.totalorder %v9_v7, 1 }
   0x5   :  { %vm58_vm5 = vcmp.lt.s32.totalorder %v9_v7, 7 }
   0x6   :  { %37 = vrot.lane.b32.xlu1 %v26_v1, %s79_s8  ;;  %30 = vrot.lane.b32.xlu0 %v26_v1, %s80_s9  ;;  %vm34_vm0 = vcmp.le.s32.totalorder %v17_v4, 14  ;;  %vm27_vm1 = vcmp.ge.s32.totalorder %v17_v4, 1  ;;  %vm55_vm4 = vcmp.le.s32.totalorder %v10_v14, 14 }
  0x74   :  { %v36_v5 = vpop.permute.xlu1 %35  ;;  %v29_v6 = vpop.permute.xlu0 %28 }
  0x75   :  { %v39_v8 = vsel %vm34_vm0, %v36_v5, -inf  ;;  %v32_v9 = vsel %vm27_vm1, %v29_v6, -inf }
  0x76   :  { %v41_v10 = vmax.f32 %v32_v9, %v39_v8 }
  0x78   :  { %v38_v11 = vpop.permute.xlu1 %37  ;;  %v31_v12 = vpop.permute.xlu0 %30  ;;  %v43_v16 = vmax.f32 %v25_v0, %v41_v10 }
  0x79   :  { %v40_v13 = vsel %vm34_vm0, %v38_v11, -inf  ;;  %v33_v15 = vsel %vm27_vm1, %v31_v12, -inf }
  0x7a   :  { %v42_v17 = vmax.f32 %v33_v15, %v40_v13  ;;  %v47_v19 = vrot.slane %v43_v16, 7  ;;  %v56_v20 = vrot.slane %v43_v16, 1 }
  0x7c   :  { %v44_v18 = vmax.f32 %v26_v1, %v42_v17 }
  0x7e   :  { %v48_v21 = vrot.slane %v44_v18, 7  ;;  %v57_v22 = vrot.slane %v44_v18, 1 }
  0x80   :  { %v50_v23 = vsel %vm49_vm3, %v47_v19, %v48_v21  ;;  %v51_v24 = vsel %vm49_vm3, %v48_v21, %v47_v19  ;;  %v59_v25 = vsel %vm58_vm5, %v56_v20, %v57_v22  ;;  %v60_v26 = vsel %vm58_vm5, %v57_v22, %v56_v20 }
  0x81   :  { %v52_v27 = vsel %vm45_vm2, %v51_v24, -inf  ;;  %v62_v28 = vsel %vm55_vm4, %v60_v26, -inf }
  0x82   :  { %v63_v29 = vmax.f32 %v52_v27, %v59_v25  ;;  %v64_v30 = vmax.f32 %v50_v23, %v62_v28 }
  0x84   :  { %v65_v31 = vmax.f32 %v43_v16, %v63_v29  ;;  %v66_v32 = vmax.f32 %v44_v18, %v64_v30 }
  0x86   :  { %vm67_vm6 = vcmp.eq.f32.partialorder %v65_v31, %v25_v0  ;;  %vm68_vm7 = vcmp.eq.f32.partialorder %v66_v32, %v26_v1 }
  0x87   :  { %v69_v33 = vsel %vm67_vm6, %v25_v0, 0.0  ;;  %v70_v34 = vsel %vm68_vm7, %v26_v1, 0.0 }
  0x88   :  { %71 = vst [vmem:[%s104_s1] sm:$0xff] %v69_v33  ;;  %72 = vst [vmem:[%s104_s1 + $0x8] sm:$0xff] %v70_v34 }

// kernel: custom-call.32
= control target key start
LH: loop header
LB: loop body
LE: loop exit
PB: predicated region body
PF: predicated region fallthrough
CT: control target
= control target key end

     0   :  { %5 = vsyncpa [#allocation6], 0  ;;  %s896_s0 = inlined_call_operand.vmem [shape: f32[2,3,3], index: 0, kind: input, shape index: {}]   ;;  %s897_s1 = inlined_call_operand.vmem [shape: f32[2,3,3], index: 1, kind: output, shape index: {0}]   ;;  %s898_s2 = inlined_call_operand.hbm [shape: s32[2,3], index: 2, kind: output, shape index: {1}]   ;;  %s899_s3 = inlined_call_operand.vmem [shape: s32[2,3], index: 3, kind: output, shape index: {2}]  }
   0x1   :  { %7 = vsyncpa [#allocation6 + $0x1], 0  ;;  %s715_s12 = smov 0   ;;  %s717_s13 = smov 0  }
   0x2   :  { %s719_s14 = smov 0   ;;  %s721_s15 = smov 0  }
   0x3 LB: > { %s736_s16 = sadd.s32 4294967295, %s687_s15   ;;  %s550_s17 = sadd.s32 4294967294, %s687_s15   ;;  %s687_s15 = sphi %s721_s15, %s907_s15   ;;  %s683_s14 = sphi %s719_s14, %s906_s14   ;;  %s679_s13 = sphi %s717_s13, %s905_s13   ;;  %s675_s12 = sphi %s715_s12, %s904_s12  }
   0x4   : > { %s740_s18 = sadd.s32 1, %s687_s15   ;;  %s17_s19 = sshrl.u32 %s687_s15, 3 }
   0x5   : > { %s18_s20 = sshrl.u32 %s740_s18, 3  ;;  %s22_s21 = sadd.s32 1, %s683_s14 }
   0x6   : > { %s19_s22 = ssub.s32 %s17_s19, %s18_s20  ;;  %p32_p0 = scmp.ne.s32.totalorder %s683_s14, %s679_s13 }
   0x7   : > { %p20_p1 = scmp.eq.s32.totalorder %s19_s22, 0  ;;  %p33_p2 = scmp.eq.s32.totalorder %s736_s16, 1 }
   0x8   : > { %p38_p3 = scmp.ne.s32.totalorder %s679_s13, %s675_s12  ;;  %p39_p4 = scmp.eq.s32.totalorder %s550_s17, 1 }
   0x9   : > { %s751_s23 = scalar_select %p20_p1, %s683_s14, %s22_s21  }
   0xa   : > { %p753_p5 = por %p33_p2, %p32_p0  ;;  %p757_p6 = por %p39_p4, %p38_p3 }
   0xb   : > { %p552_p7 = scmp.ge.s32.totalorder %s687_s15, 2 }
   0xc   : > { %s85_s26 = sand.u32 (!%p552_p7), 1, %s687_s15   ;;  %s554_s27 = sshll.u32 (!%p552_p7), %s687_s15, 2 }
   0xd   : > { %83 = sbr.rel (%p552_p7) target bundleno = 20 (0x14), region = 16  ;;  %s553_s28 = sshll.u32 (!%p552_p7), %s85_s26, 2 }
   0xe   : > { %s89_s4 = scalar_lea.vmem (!%p552_p7), %s896_s0, %s554_s27  ;;  %s87_s5 = scalar_lea.vmem (!%p552_p7), [#allocation1], %s553_s28 }
   0xf   : > { %v105_v0 = vld [vmem:[%s89_s4] sm:$0xf] (!%p552_p7) }
  0x10   : > { %106 = vst [vmem:[%s87_s5] sm:$0xf] (!%p552_p7), %v105_v0 }
  0x14 PF: > { %p555_p8 = scmp.ge.s32.totalorder %s687_s15, 1  ;;  %p122_p9 = scmp.lt.s32.totalorder %s687_s15, 3 }
  0x16   : > { %p123_p10 = pnand %p555_p8, %p122_p9 }
  0x18   : > { %126 = sbr.rel (%p123_p10) target bundleno = 451 (0x1c3), region = 50 }
  0x1f   : > { %s133_s6 = sand.u32 1, %s736_s16   ;;  %s144_s7 = sand.u32 1, %s679_s13   ;;  %v166_v1 = vlaneseq  ;;  %v693_v4 = vmov 0  }
  0x20   : > { %s773_s8 = sshll.u32 %s133_s6, 2  ;;  %s777_s9 = sshll.u32 %s144_s7, 1 }
  0x21   : > { %v780_v2 = vshrl.u32 %v166_v1, 7  ;;  %s135_s10 = scalar_lea.vmem [#allocation1], %s773_s8  ;;  %s161_s11 = sand.u32 7, %s736_s16  }
  0x22   : > { %v155_v3 = vld [vmem:[%s135_s10] sm:$0xf]  ;;  %s785_s17 = scalar_lea.vmem [#allocation4], %s161_s11  ;;  %s139_s19 = scalar_lea.vmem [#allocation3], %s773_s8 }
  0x23   : > { %156 = vst [vmem:[#allocation0] sm:$0xf] %v155_v3  ;;  %170 = vst [vmem:[#allocation9] sm:$0xff] %v780_v2  ;;  %s146_s20 = scalar_lea.vmem [#allocation5], %s777_s9  ;;  %s152_s21 = scalar_lea.vmem [#allocation8], %s777_s9 }
  0x24   : > { %165 = vst [vmem:[%s785_s17] sm:$0x1] %v693_v4  ;;  %s791_s22 = scalar_lea.vmem [#allocation7], %s161_s11  ;;  %s793_s26 = smov 0  }
  0x2a   : > { %v159_v5 = vld [vmem:[#allocation0] sm:$0xff] }
  0x2b   : > { %160 = vst [vmem:[#allocation2] sm:$0xff] %v159_v5 }
  0x2c LB: >> { %vm186_vm0 = vcmp.lt.s32.totalorder %v780_v2, 3  ;;  %v800_v8 = vstv %s691_s26  ;;  %s227_s27 = ssub.s32 128, %s691_s26  ;;  %v233_v38 = vand.u32 127, %v166_v1  ;;  %v236_v40 = vld [vmem:[%s785_s17] ss:$0 sm:$0xff]  ;;  %s239_s28 = scalar_lea.vmem [#allocation2], %s691_s26  ;;  %s691_s26 = sphi %s793_s26, %s176_s26  }
  0x2d   : >> { %vm185_vm1 = vcmp.ge.s32.totalorder %v780_v2, %v800_v8  ;;  %s245_s30 = scalar_lea.vmem [#allocation9], %s691_s26  ;;  %vm265_vm15 = vcmp.gt.s32.totalorder %v780_v2, %v800_v8  ;;  %s176_s26 = sadd.s32 1, %s691_s26  }
  0x2e   : >> { %vm187_vm3 = vmand %vm185_vm1, %vm186_vm0  ;;  %vm257_vm12 = vcmp.gt.s32.totalorder %v233_v38, %v800_v8  ;;  %vm234_vm13 = vcmp.eq.s32.totalorder %v233_v38, %v800_v8  ;;  %v247_v42 = vld [vmem:[%s245_s30] ss:$0 sm:$0xff]  ;;  %p173_p11 = scmp.ge.s32.totalorder %s176_s26, 3  }
  0x2f   : >> { %vm269_vm1 = vmand %vm265_vm15, %vm234_vm13  ;;  %s900_s6 = sshrl.u32 (%p173_p11), %s736_s16, 3  ;;  %s564_s10 = sshll.u32 (%p173_p11), %s736_s16, 2 }
  0x30   : > { %s565_s11 = sshll.u32 (%p173_p11), %s900_s6, 5 }
  0x32   : >> { %v181_v6 = vld [vmem:[#allocation2] sm:$0xff]  ;;  %v241_v41 = vld [vmem:[%s239_s28] ss:$0 sm:$0xff] }
  0x33   : >> { %v182_v7 = vand.u32 2147483647, %v181_v6 }
  0x35   : >> { %vm560_vm2 = vcmp.gt.f32.partialorder %v182_v7, -inf }
  0x36   : >> { %vm189_vm4 = vmand %vm187_vm3, %vm560_vm2 }
  0x37   : >> { %v190_v9 = vsel %vm189_vm4, %v780_v2, %v800_v8  ;;  %v191_v10 = vsel %vm189_vm4, %v182_v7, -inf }
  0x38   : >> { %v192_v11 = vrot.slane %v191_v10, 1  ;;  %v193_v12 = vrot.slane %v190_v9, 1 }
  0x3a   : >> { %vm194_vm5 = vcmp.ge.f32.partialorder %v192_v11, %v191_v10  ;;  %v197_v13 = vrot.slane %v192_v11, 1  ;;  %v198_v14 = vrot.slane %v193_v12, 1 }
  0x3b   : >> { %v195_v15 = vsel %vm194_vm5, %v192_v11, %v191_v10  ;;  %v196_v16 = vsel %vm194_vm5, %v193_v12, %v190_v9 }
  0x3c   : >> { %vm199_vm6 = vcmp.ge.f32.partialorder %v197_v13, %v195_v15  ;;  %v202_v17 = vrot.slane %v197_v13, 1  ;;  %v203_v18 = vrot.slane %v198_v14, 1 }
  0x3d   : >> { %v200_v19 = vsel %vm199_vm6, %v197_v13, %v195_v15  ;;  %v201_v20 = vsel %vm199_vm6, %v198_v14, %v196_v16 }
  0x3e   : >> { %vm204_vm7 = vcmp.ge.f32.partialorder %v202_v17, %v200_v19  ;;  %v207_v21 = vrot.slane %v202_v17, 1  ;;  %v208_v22 = vrot.slane %v203_v18, 1 }
  0x3f   : >> { %v205_v23 = vsel %vm204_vm7, %v202_v17, %v200_v19  ;;  %v206_v24 = vsel %vm204_vm7, %v203_v18, %v201_v20 }
  0x40   : >> { %vm209_vm8 = vcmp.ge.f32.partialorder %v207_v21, %v205_v23  ;;  %v212_v25 = vrot.slane %v207_v21, 1  ;;  %v213_v26 = vrot.slane %v208_v22, 1 }
  0x41   : >> { %v210_v27 = vsel %vm209_vm8, %v207_v21, %v205_v23  ;;  %v211_v28 = vsel %vm209_vm8, %v208_v22, %v206_v24 }
  0x42   : >> { %vm214_vm9 = vcmp.ge.f32.partialorder %v212_v25, %v210_v27  ;;  %v217_v29 = vrot.slane %v212_v25, 1  ;;  %v218_v30 = vrot.slane %v213_v26, 1 }
  0x43   : >> { %v215_v31 = vsel %vm214_vm9, %v212_v25, %v210_v27  ;;  %v216_v32 = vsel %vm214_vm9, %v213_v26, %v211_v28 }
  0x44   : >> { %vm219_vm10 = vcmp.ge.f32.partialorder %v217_v29, %v215_v31  ;;  %v222_v33 = vrot.slane %v217_v29, 1  ;;  %v223_v34 = vrot.slane %v218_v30, 1 }
  0x45   : >> { %v220_v35 = vsel %vm219_vm10, %v217_v29, %v215_v31  ;;  %v221_v36 = vsel %vm219_vm10, %v218_v30, %v216_v32 }
  0x46   : >> { %vm224_vm11 = vcmp.ge.f32.partialorder %v222_v33, %v220_v35 }
  0x47   : >> { %v226_v37 = vsel %vm224_vm11, %v223_v34, %v221_v36 }
  0x48   : >> { %228 = vrot.lane.b32.xlu0 %v226_v37, %s227_s27  ;;  %s357_s27 = scalar_lea.vmem (%p173_p11), %s897_s1, %s564_s10 }
  0xba   : >> { %v229_v39 = vpop.permute.xlu0 %228 }
  0xbb   : >> { %569 = vpush %v229_v39 }
  0xec   : >> { %s570_s29 = spop %569 }
  0xed   : >> { %v235_v43 = vstv %s570_s29  ;;  %s240_s4 = scalar_lea.vmem [#allocation2], %s570_s29  ;;  %s246_s5 = scalar_lea.vmem [#allocation9], %s570_s29 }
  0xee   : >> { %v242_v44 = vld [vmem:[%s240_s4] ss:$0 sm:$0xff]  ;;  %v237_v46 = vsel %vm234_vm13, %v235_v43, %v236_v40 }
  0xef   : >> { %v248_v45 = vld [vmem:[%s246_s5] ss:$0 sm:$0xff]  ;;  %243 = vst [vmem:[%s240_s4] sm:$0x1] %v241_v41  ;;  %vm251_vm14 = vcmp.ne.f32.partialorder %v242_v44, 0.0  ;;  %238 = vst [vmem:[%s785_s17] sm:$0x1] %v237_v46  ;;  %v258_v53 = vsel %vm257_vm12, %v242_v44, 0.0 }
  0xf0   : >> { %249 = vst [vmem:[%s246_s5] sm:$0x1] %v247_v42  ;;  %244 = vst [vmem:[%s239_s28] sm:$0x1] %v242_v44  ;;  %s399_s4 = sshll.u32 (%p173_p11), %s146_s20, 4  ;;  %s348_s5 = scalar_lea.sflag (%p173_p11), [#allocation6], %s144_s7  ;;  %s400_s4 = int_to_ptr.vmem [resolvable:$true] %s399_s4 }
  0xf1   : >> { %250 = vst [vmem:[%s245_s30] sm:$0x1] %v248_v45  ;;  %vm252_vm0 = vmand %vm234_vm13, %vm251_vm14  ;;  %s843_s30 = scalar_lea.hbm (%p173_p11), %s898_s2, %s565_s11  ;;  %s621_s6 = scalar_lea.vmem (%p173_p11), %s400_s4, 32 }
  0xf2   : >> { %v253_v47 = vsel %vm252_vm0, %v242_v44, 1.0  ;;  %p622_p12 = scmp.ne.s32.totalorder (%p173_p11), %s400_s4, %s621_s6  ;;  %s694_s17 = smov (%p173_p11), [#allocation5]  }
  0xf3   : >> { %v266_v48 = vsel %vm265_vm15, %v253_v47, 1.0  ;;  %s625_s10 = sshll.u32 (%p173_p11), %s694_s17, 4  ;;  %s626_s10 = int_to_ptr.vmem [resolvable:$false] %s625_s10 }
  0xf4   : >> { %619 = vrcp.f32 %v266_v48  ;;  %p623_p13 = pnand (%p173_p11), %p622_p12, %p753_p5  ;;  %s627_s8 = scalar_lea.vmem (%p173_p11), %s626_s10, 64 }
  0xf5   : > { %p628_p1 = scmp.lt.s32.totalorder (%p173_p11), %s400_s4, %s626_s10  ;;  %p629_p2 = scmp.lt.s32.totalorder (%p173_p11), %s627_s8, %s621_s6 }
  0xf6   : > { %v334_v59 = vld [vmem:[#allocation4] sm:$0x3] (%p173_p11)  ;;  %p624_p0 = pneg (%p173_p11), %p623_p13 }
  0xf7   : >> { %v262_v50 = vld [vmem:[#allocation2] sm:$0xff]  ;;  %336 = vst [vmem:[%s146_s20] sm:$0x3] (%p173_p11), %v334_v59  ;;  %p630_p3 = por (%p173_p11), %p629_p2, %p628_p1 }
  0xf8   : > { %v276_v57 = vld [vmem:[#allocation9] sm:$0xff] (%p173_p11) }
  0xf9   : > { %p631_p4 = pnand (%p173_p11), %p630_p3, %p624_p0 }
  0xfe   : >> { %v620_v49 = vpop.eup %619 }
  0xff   : >> { %v268_v51 = vmul.f32 %v620_v49, %v262_v50 }
 0x101   : >> { %v270_v52 = vsel %vm269_vm1, %v268_v51, 0.0 }
 0x102   : >> { %271 = vadd.xlane.f32.xlu0 %v270_v52 }
 0x12f   : > { %292 = vxpose.xlu0.b32.start.end [1/1] (short) (narrow) (%p173_p11), %v276_v57, 8 }
 0x18e   : > { %175 = sbr.rel (!%p173_p11) target bundleno = 44 (0x2c), region = 202 }
 0x18f   : >> { %v272_v54 = vpop.xlane.xlu0 %271 }
 0x190   : >> { %v273_v55 = vmul.f32 %v272_v54, %v258_v53 }
 0x192   : >> { %v274_v56 = vsub.f32 %v268_v51, %v273_v55 }
 0x194   : >> { %275 = vst [vmem:[#allocation2] sm:$0xff] %v274_v56 }
 0x19b   : > { %v328_v58 = vld [vmem:[#allocation2] sm:$0xf] }
 0x19c   : > { %330 = vst [vmem:[%s139_s19] sm:$0xf] %v328_v58 }
 0x1a3   : > { %v373_v60 = vld [vmem:[%s139_s19] sm:$0xf] }
 0x1a4   : > { %374 = vst [vmem:[%s357_s27] sm:$0xf] %v373_v60 }
 0x1a5   : > { %634 = shalt.err (!%p631_p4)
}
 0x1a6   : > { %s635_s7 = scalar_lea.hbm %s843_s30, 32  ;;  %s639_s11 = scalar_lea.hbm %s898_s2, 32 }
 0x1a7   : > { %p636_p8 = scmp.ne.s32.totalorder %s843_s30, %s635_s7  ;;  %p640_p11 = scmp.lt.u32.totalorder %s843_s30, %s898_s2 }
 0x1a8   : > { %p641_p12 = scmp.lt.u32.totalorder %s639_s11, %s635_s7  ;;  %p643_p0 = scmp.lt.u32.totalorder %s635_s7, %s843_s30 }
 0x1a9   : > { %p637_p9 = pnand %p636_p8, %p753_p5 }
 0x1aa   : > { %p642_p13 = por %p641_p12, %p640_p11 }
 0x1ab   : > { %p638_p10 = pneg %p637_p9 }
 0x1ac   : > { %p644_p1 = por %p643_p0, %p642_p13 }
 0x1ae   : > { %p645_p2 = pnand %p644_p1, %p638_p10 }
 0x1b0   : > { %648 = shalt.err (!%p645_p2)
}
 0x1b1   : > { %571 = dma.vmem_to_hbm [thread:$0]  (%p753_p5), %s400_s4, 32, %s843_s30, %s348_s5   ;;  %v308_v61 = vpop.trf.xlu0 }
 0x1b2   : > { %324 = vst [vmem:[%s791_s22] sm:$0x1] %v308_v61  ;;  %s903_s6 = sshrl.u32 (%p753_p5), %s736_s16, 3 }
 0x1b3   : > { %s566_s28 = sshll.u32 (%p753_p5), %s903_s6, 1 }
 0x1b4   : > { %405 = sbr.rel (!%p753_p5) target bundleno = 451 (0x1c3), region = 96  ;;  %s408_s10 = scalar_lea.vmem (%p753_p5), %s899_s3, %s566_s28 }
 0x1b9   : > { %v340_v62 = vld [vmem:[#allocation7] sm:$0x3] }
 0x1ba   : > { %342 = vst [vmem:[%s152_s21] sm:$0x3] %v340_v62 }
 0x1c1   : > { %v424_v63 = vld [vmem:[%s152_s21] sm:$0x3] }
 0x1c2   : > { %425 = vst [vmem:[%s408_s10] sm:$0x3] %v424_v63 }
 0x1c3 PF: > { %s452_s22 = sand.u32 1, %s675_s12   ;;  %p574_p5 = pnand %p552_p7, %p757_p6 }
 0x1c4   : > { %s453_s24 = scalar_lea.sflag [#allocation6], %s452_s22 }
 0x1c5   : > { %670 = dma.done.wait (!%p574_p5), %s453_s24, 32  }
 0x1c6   : > { %672 = vsyncadd (!%p574_p5), %s453_s24, 4294967264  ;;  %p10_p3 = scmp.ge.s32.totalorder %s740_s18, 4   ;;  %s904_s12 = smov %s679_s13 }
 0x1c7   : > { %s905_s13 = smov %s683_s14  ;;  %s906_s14 = smov %s751_s23 }
 0x1c8   : > { %s907_s15 = smov %s740_s18  ;;  %12 = sbr.rel (!%p10_p3) target bundleno = 3 (0x3), region = 213 }
 0x1cf   :  { %465 = vsyncpa [#allocation6], 1 }
 0x1d0   :  { %467 = vsyncpa [#allocation6 + $0x1], 1 }

// kernel: custom-call.34
= control target key start
LH: loop header
LB: loop body
LE: loop exit
PB: predicated region body
PF: predicated region fallthrough
CT: control target
= control target key end

     0   :  { %s343_s6 = smov 0   ;;  %s345_s7 = smov 0   ;;  %s390_s0 = inlined_call_operand.vmem [shape: f32[2,1,3,3], index: 0, kind: input, shape index: {}]   ;;  %s391_s1 = inlined_call_operand.vmem [shape: f32[2,1,3,3], index: 1, kind: output, shape index: {}]  }
   0x1   :  { %s347_s8 = smov 0  }
   0x2 LB: > { %s269_s9 = sadd.s32 4294967295, %s330_s8   ;;  %s33_s10 = sadd.s32 1, %s326_s7  ;;  %s330_s8 = sphi %s347_s8, %s7_s8   ;;  %s326_s7 = sphi %s345_s7, %s393_s7   ;;  %s322_s6 = sphi %s343_s6, %s392_s6  }
   0x3   : > { %p35_p0 = scmp.ge.s32.totalorder %s33_s10, 2  ;;  %p271_p1 = scmp.ge.s32.totalorder %s330_s8, 2 }
   0x4   : > { %s49_s11 = sand.u32 (!%p271_p1), 1, %s330_s8   ;;  %s273_s12 = sshll.u32 (!%p271_p1), %s326_s7, 2 }
   0x5   : > { %s395_s10 = smov (%p35_p0, %s33_s10), 0  ;;  %47 = sbr.rel (%p271_p1) target bundleno = 12 (0xc), region = 16 }
   0x6   : > { %s272_s13 = sshll.u32 (!%p271_p1), %s49_s11, 2  ;;  %s56_s16 = scalar_lea.vmem (!%p271_p1), %s390_s0, %s273_s12 }
   0x7   : > { %v72_v0 = vld [vmem:[%s56_s16] sm:$0xf] (!%p271_p1)  ;;  %s51_s17 = scalar_lea.vmem (!%p271_p1), [#allocation1], %s272_s13 }
   0x8   : > { %73 = vst [vmem:[%s51_s17] sm:$0xf] (!%p271_p1), %v72_v0 }
   0xc PF: > { %p274_p2 = scmp.ge.s32.totalorder %s330_s8, 1  ;;  %p89_p3 = scmp.lt.s32.totalorder %s330_s8, 3 }
   0xe   : > { %p90_p4 = pnand %p274_p2, %p89_p3 }
  0x10   : > { %93 = sbr.rel (%p90_p4) target bundleno = 511 (0x1ff), region = 50 }
  0x17   : > { %s370_s18 = sand.u32 1, %s269_s9   ;;  %v111_v1 = vlaneseq  ;;  %v332_v11 = vmov -1.0   ;;  %s278_s22 = sshll.u32 %s322_s6, 2 }
  0x18   : > { %s275_s19 = sshll.u32 %s370_s18, 2  ;;  %s178_s25 = scalar_lea.vmem %s391_s1, %s278_s22 }
  0x19   : > { %s102_s20 = scalar_lea.vmem [#allocation1], %s275_s19  ;;  %v112_v3 = vand.u32 127, %v111_v1  ;;  %v115_v4 = vshrl.u32 %v111_v1, 7  ;;  %s106_s21 = scalar_lea.vmem [#allocation3], %s275_s19 }
  0x1a   : > { %v109_v2 = vld [vmem:[%s102_s20] sm:$0xf] }
  0x1b   : > { %110 = vst [vmem:[#allocation0] sm:$0xf] %v109_v2  ;;  %vm113_vm0 = vcmp.lt.s32.totalorder %v112_v3, 3  ;;  %vm122_vm1 = vcmp.ge.s32.totalorder %v115_v4, %v112_v3  ;;  %vm117_vm2 = vcmp.eq.s32.totalorder %v115_v4, %v112_v3  ;;  %vm136_vm4 = vcmp.eq.s32.totalorder %v112_v3, 0 }
  0x1c   : > { %vm123_vm3 = vmand %vm122_vm1, %vm113_vm0  ;;  %vm133_vm5 = vcmp.eq.s32.totalorder %v112_v3, %v115_v4  ;;  %v137_v12 = vsel %vm136_vm4, 1.0, %v332_v11  ;;  %vm144_vm6 = vcmp.eq.s32.totalorder %v112_v3, 1  ;;  %vm154_vm7 = vcmp.eq.s32.totalorder %v112_v3, 2 }
  0x1d   : > { %v138_v13 = vsel %vm133_vm5, %v137_v12, 0.0 }
  0x22   : > { %v118_v5 = vld [vmem:[#allocation0] sm:$0xff] }
  0x23   : > { %v119_v6 = vsel %vm117_vm2, %v118_v5, 0.0  ;;  %v124_v7 = vsel %vm123_vm3, %v118_v5, 0.0 }
  0x24   : > { %120 = vadd.xlane.f32.xlu0 %v119_v6 }
  0xb1   : > { %v121_v8 = vpop.xlane.xlu0 %120 }
  0xb2   : > { %306 = vrcp.f32 %v121_v8  ;;  %vm161_vm8 = vweird.f32 %v121_v8 }
  0xbc   : > { %v307_v9 = vpop.eup %306 }
  0xbd   : > { %v126_v10 = vmul.f32 %v307_v9, %v124_v7 }
  0xbf   : > { %127 = vst [vmem:[#allocation4] sm:$0xff] %v126_v10 }
  0xc6   : > { %v140_v14 = vld [vmem:[#allocation4 + $0x1] ss:$0 sm:$0xff]  ;;  %v150_v17 = vld [vmem:[#allocation4 + $0x2] ss:$0 sm:$0xff] }
  0xc7   : > { %v141_v15 = vxor.u32 2147483648, %v140_v14  ;;  %v151_v19 = vxor.u32 2147483648, %v150_v17 }
  0xc9   : > { %v145_v16 = vmul.f32 %v141_v15, %v138_v13 }
  0xcb   : > { %146 = vadd.xlane.f32.xlu0 %v145_v16 }
 0x158   : > { %v147_v18 = vpop.xlane.xlu0 %146 }
 0x159   : > { %v148_v20 = vsel %vm144_vm6, %v147_v18, %v138_v13 }
 0x15a   : > { %v155_v21 = vmul.f32 %v151_v19, %v148_v20 }
 0x15c   : > { %156 = vadd.xlane.f32.xlu1 %v155_v21 }
 0x1e9   : > { %v157_v22 = vpop.xlane.xlu1 %156 }
 0x1ea   : > { %v158_v23 = vsel %vm154_vm7, %v157_v22, %v148_v20 }
 0x1eb   : > { %v160_v24 = vmul.f32 %v307_v9, %v158_v23 }
 0x1ed   : > { %v162_v25 = vsel %vm161_vm8, %v158_v23, %v160_v24 }
 0x1ee   : > { %163 = vst [vmem:[#allocation2] sm:$0xff] %v162_v25 }
 0x1f5   : > { %v167_v26 = vld [vmem:[#allocation2] sm:$0xf] }
 0x1f6   : > { %169 = vst [vmem:[%s106_s21] sm:$0xf] %v167_v26 }
 0x1fd   : > { %v194_v27 = vld [vmem:[%s106_s21] sm:$0xf] }
 0x1fe   : > { %195 = vst [vmem:[%s178_s25] sm:$0xf] %v194_v27 }
 0x1ff PF: > { %s7_s8 = sadd.s32 1, %s330_s8   ;;  %s392_s6 = smov %s326_s7 }
 0x200   : > { %p4_p5 = scmp.ge.s32.totalorder %s7_s8, 4   ;;  %s393_s7 = smov %s395_s10 }
 0x202   :  { %6 = sbr.rel (!%p4_p5) target bundleno = 2 (0x2), region = 112 }

// kernel: custom-call.33
= control target key start
LH: loop header
LB: loop body
LE: loop exit
PB: predicated region body
PF: predicated region fallthrough
CT: control target
= control target key end

     0   :  { %s342_s6 = smov 0   ;;  %s344_s7 = smov 0   ;;  %s389_s0 = inlined_call_operand.vmem [shape: f32[2,1,3,3], index: 0, kind: input, shape index: {}]   ;;  %s390_s1 = inlined_call_operand.vmem [shape: f32[2,1,3,3], index: 1, kind: output, shape index: {}]  }
   0x1   :  { %s346_s8 = smov 0  }
   0x2 LB: > { %s268_s9 = sadd.s32 4294967295, %s329_s8   ;;  %s33_s10 = sadd.s32 1, %s325_s7  ;;  %s329_s8 = sphi %s346_s8, %s7_s8   ;;  %s325_s7 = sphi %s344_s7, %s392_s7   ;;  %s321_s6 = sphi %s342_s6, %s391_s6  }
   0x3   : > { %p35_p0 = scmp.ge.s32.totalorder %s33_s10, 2  ;;  %p270_p1 = scmp.ge.s32.totalorder %s329_s8, 2 }
   0x4   : > { %s49_s11 = sand.u32 (!%p270_p1), 1, %s329_s8   ;;  %s272_s12 = sshll.u32 (!%p270_p1), %s325_s7, 2 }
   0x5   : > { %s394_s10 = smov (%p35_p0, %s33_s10), 0  ;;  %47 = sbr.rel (%p270_p1) target bundleno = 12 (0xc), region = 16 }
   0x6   : > { %s271_s13 = sshll.u32 (!%p270_p1), %s49_s11, 2  ;;  %s56_s16 = scalar_lea.vmem (!%p270_p1), %s389_s0, %s272_s12 }
   0x7   : > { %v72_v0 = vld [vmem:[%s56_s16] sm:$0xf] (!%p270_p1)  ;;  %s51_s17 = scalar_lea.vmem (!%p270_p1), [#allocation1], %s271_s13 }
   0x8   : > { %73 = vst [vmem:[%s51_s17] sm:$0xf] (!%p270_p1), %v72_v0 }
   0xc PF: > { %p273_p2 = scmp.ge.s32.totalorder %s329_s8, 1  ;;  %p89_p3 = scmp.lt.s32.totalorder %s329_s8, 3 }
   0xe   : > { %p90_p4 = pnand %p273_p2, %p89_p3 }
  0x10   : > { %93 = sbr.rel (%p90_p4) target bundleno = 511 (0x1ff), region = 50 }
  0x17   : > { %s369_s18 = sand.u32 1, %s268_s9   ;;  %v111_v1 = vlaneseq  ;;  %v331_v11 = vmov -1.0   ;;  %s277_s22 = sshll.u32 %s321_s6, 2 }
  0x18   : > { %s274_s19 = sshll.u32 %s369_s18, 2  ;;  %s177_s25 = scalar_lea.vmem %s390_s1, %s277_s22 }
  0x19   : > { %s102_s20 = scalar_lea.vmem [#allocation1], %s274_s19  ;;  %v112_v3 = vand.u32 127, %v111_v1  ;;  %v115_v4 = vshrl.u32 %v111_v1, 7  ;;  %s106_s21 = scalar_lea.vmem [#allocation3], %s274_s19 }
  0x1a   : > { %v109_v2 = vld [vmem:[%s102_s20] sm:$0xf] }
  0x1b   : > { %110 = vst [vmem:[#allocation0] sm:$0xf] %v109_v2  ;;  %vm113_vm0 = vcmp.lt.s32.totalorder %v112_v3, 3  ;;  %vm122_vm1 = vcmp.le.s32.totalorder %v115_v4, %v112_v3  ;;  %vm117_vm2 = vcmp.eq.s32.totalorder %v115_v4, %v112_v3  ;;  %vm136_vm4 = vcmp.eq.s32.totalorder %v112_v3, 2 }
  0x1c   : > { %vm123_vm3 = vmand %vm122_vm1, %vm113_vm0  ;;  %vm133_vm5 = vcmp.eq.s32.totalorder %v112_v3, %v115_v4  ;;  %v137_v12 = vsel %vm136_vm4, 1.0, %v331_v11  ;;  %vm144_vm6 = vcmp.eq.s32.totalorder %v112_v3, 1  ;;  %vm153_vm7 = vcmp.eq.s32.totalorder %v112_v3, 0 }
  0x1d   : > { %v138_v13 = vsel %vm133_vm5, %v137_v12, 0.0 }
  0x22   : > { %v118_v5 = vld [vmem:[#allocation0] sm:$0xff] }
  0x23   : > { %v119_v6 = vsel %vm117_vm2, %v118_v5, 0.0  ;;  %v124_v7 = vsel %vm123_vm3, %v118_v5, 0.0 }
  0x24   : > { %120 = vadd.xlane.f32.xlu0 %v119_v6 }
  0xb1   : > { %v121_v8 = vpop.xlane.xlu0 %120 }
  0xb2   : > { %305 = vrcp.f32 %v121_v8  ;;  %vm160_vm8 = vweird.f32 %v121_v8 }
  0xbc   : > { %v306_v9 = vpop.eup %305 }
  0xbd   : > { %v126_v10 = vmul.f32 %v306_v9, %v124_v7 }
  0xbf   : > { %127 = vst [vmem:[#allocation4] sm:$0xff] %v126_v10 }
  0xc6   : > { %v140_v14 = vld [vmem:[#allocation4 + $0x1] ss:$0 sm:$0xff]  ;;  %v149_v17 = vld [vmem:[#allocation4] ss:$0 sm:$0xff] }
  0xc7   : > { %v141_v15 = vxor.u32 2147483648, %v140_v14  ;;  %v150_v19 = vxor.u32 2147483648, %v149_v17 }
  0xc9   : > { %v145_v16 = vmul.f32 %v141_v15, %v138_v13 }
  0xcb   : > { %146 = vadd.xlane.f32.xlu0 %v145_v16 }
 0x158   : > { %v147_v18 = vpop.xlane.xlu0 %146 }
 0x159   : > { %v148_v20 = vsel %vm144_vm6, %v147_v18, %v138_v13 }
 0x15a   : > { %v154_v21 = vmul.f32 %v150_v19, %v148_v20 }
 0x15c   : > { %155 = vadd.xlane.f32.xlu1 %v154_v21 }
 0x1e9   : > { %v156_v22 = vpop.xlane.xlu1 %155 }
 0x1ea   : > { %v157_v23 = vsel %vm153_vm7, %v156_v22, %v148_v20 }
 0x1eb   : > { %v159_v24 = vmul.f32 %v306_v9, %v157_v23 }
 0x1ed   : > { %v161_v25 = vsel %vm160_vm8, %v157_v23, %v159_v24 }
 0x1ee   : > { %162 = vst [vmem:[#allocation2] sm:$0xff] %v161_v25 }
 0x1f5   : > { %v166_v26 = vld [vmem:[#allocation2] sm:$0xf] }
 0x1f6   : > { %168 = vst [vmem:[%s106_s21] sm:$0xf] %v166_v26 }
 0x1fd   : > { %v193_v27 = vld [vmem:[%s106_s21] sm:$0xf] }
 0x1fe   : > { %194 = vst [vmem:[%s177_s25] sm:$0xf] %v193_v27 }
 0x1ff PF: > { %s7_s8 = sadd.s32 1, %s329_s8   ;;  %s391_s6 = smov %s325_s7 }
 0x200   : > { %p4_p5 = scmp.ge.s32.totalorder %s7_s8, 4   ;;  %s392_s7 = smov %s394_s10 }
 0x202   :  { %6 = sbr.rel (!%p4_p5) target bundleno = 2 (0x2), region = 111 }

// kernel: post_process_forward.3
= control target key start
LH: loop header
LB: loop body
LE: loop exit
PB: predicated region body
PF: predicated region fallthrough
CT: control target
= control target key end

     0   :  { %9 = vsyncpa [#allocation3], 0  ;;  %s778_s0 = inlined_call_operand.vmem [shape: f32[38,128], index: 0, kind: input, shape index: {}]   ;;  %s779_s1 = inlined_call_operand.vmem [shape: f32[2], index: 1, kind: input, shape index: {}]   ;;  %s780_s2 = inlined_call_operand.vmem [shape: f32[9], index: 2, kind: input, shape index: {}]   ;;  %s781_s3 = inlined_call_operand.vmem [shape: f32[2], index: 3, kind: input, shape index: {}]   ;;  %s782_s4 = inlined_call_operand.vmem [shape: f32[14,128], index: 4, kind: output, shape index: {}]  }
   0x1   :  { %10 = vsyncpa [#allocation5], 0  ;;  %s29_s17 = sshll.u32 %s780_s2, 4  ;;  %s19_s20 = sshll.u32 %s779_s1, 4  ;;  %s30_s17 = int_to_ptr.vmem [resolvable:$true] %s29_s17  ;;  %s20_s20 = int_to_ptr.vmem [resolvable:$true] %s19_s20 }
   0x2   :  { %s457_s21 = scalar_lea.vmem %s30_s17, 16  ;;  %p462_p1 = scmp.lt.s32.totalorder %s30_s17, %s30_s17 }
   0x3   :  { %p458_p0 = scmp.ne.s32.totalorder %s30_s17, %s457_s21  ;;  %p463_p2 = scmp.lt.s32.totalorder %s457_s21, %s457_s21 }
   0x5   :  { %p464_p3 = por %p463_p2, %p462_p1 }
   0x7   :  { %p465_p4 = pnand %p464_p3, %p458_p0 }
   0x9   :  { %468 = shalt.err (!%p465_p4)
}
   0xa   :  { %s497_s22 = smov [#allocation4]   ;;  %s469_s23 = scalar_lea.vmem %s20_s20, 16 }
   0xb   :  { %32 = dma.vmem_to_smem %s30_s17, 16, %s497_s22, [#allocation5]  }
   0xc   :  { %p470_p5 = scmp.ne.s32.totalorder %s20_s20, %s469_s23  ;;  %p474_p6 = scmp.lt.s32.totalorder %s20_s20, %s20_s20 }
   0xd   :  { %p475_p7 = scmp.lt.s32.totalorder %s469_s23, %s469_s23 }
   0xf   :  { %p476_p8 = por %p475_p7, %p474_p6 }
  0x11   :  { %p477_p9 = pnand %p476_p8, %p470_p5 }
  0x13   :  { %480 = shalt.err (!%p477_p9)
}
  0x14   :  { %s498_s2 = smov [#allocation2]   ;;  %s39_s25 = sshll.u32 %s781_s3, 4  ;;  %s40_s25 = int_to_ptr.vmem [resolvable:$true] %s39_s25 }
  0x15   :  { %22 = dma.vmem_to_smem %s20_s20, 16, %s498_s2, [#allocation3]  }
  0x16   :  { %s481_s26 = scalar_lea.vmem %s40_s25, 16  ;;  %p486_p11 = scmp.lt.s32.totalorder %s40_s25, %s40_s25 }
  0x17   :  { %p482_p10 = scmp.ne.s32.totalorder %s40_s25, %s481_s26  ;;  %p487_p12 = scmp.lt.s32.totalorder %s481_s26, %s481_s26 }
  0x19   :  { %p488_p13 = por %p487_p12, %p486_p11 }
  0x1b   :  { %p489_p0 = pnand %p488_p13, %p482_p10 }
  0x1d   :  { %492 = shalt.err (!%p489_p0)
}
  0x1e   :  { %s499_s27 = smov [#allocation6]  }
  0x1f   :  { %42 = dma.vmem_to_smem %s40_s25, 16, %s499_s27, [#allocation5]  }
  0x20   :  { %493 = dma.done.wait [#allocation3], 16  }
  0x21   :  { %494 = vsyncadd [#allocation3], 4294967280 }
  0x22   :  { %495 = dma.done.wait [#allocation5], 32  }
  0x23   :  { %496 = vsyncadd [#allocation5], 4294967264 }
  0x24   :  { %52 = sfence }
  0x25   :  { %v53_v0 = vld [vmem:[%s778_s0] sm:$0x1]  ;;  %v54_v1 = vld [vmem:[%s778_s0 + $0x1] sm:$0x1]  ;;  %s420_s5 = sld [smem:[#allocation2 + $0x1]]  ;;  %s60_s6 = sld [smem:[#allocation2]]  ;;  %v203_v59 = vlaneseq }
  0x26   :  { %v63_v2 = vld [vmem:[%s778_s0 + $0x4] sm:$0x1]  ;;  %v65_v3 = vld [vmem:[%s778_s0 + $0x5] sm:$0x1]  ;;  %v67_v4 = vld [vmem:[%s778_s0 + $0x14] sm:$0x1] }
  0x27   :  { %v64_v5 = vadd.f32 %v63_v2, %v53_v0  ;;  %v66_v6 = vadd.f32 %v65_v3, %v54_v1  ;;  %v69_v7 = vld [vmem:[%s778_s0 + $0x15] sm:$0x1]  ;;  %v74_v8 = vld [vmem:[%s778_s0 + $0x17] sm:$0x1]  ;;  %v76_v9 = vld [vmem:[%s778_s0 + $0x18] sm:$0x1] }
  0x28   :  { %v81_v10 = vld [vmem:[%s778_s0 + $0x1a] sm:$0x1]  ;;  %v56_v11 = vld [vmem:[%s778_s0 + $0x3] sm:$0x1]  ;;  %v83_v16 = vld [vmem:[%s778_s0 + $0x1b] sm:$0x1] }
  0x29   :  { %v68_v12 = vmul.f32 %v67_v4, %v64_v5  ;;  %v70_v13 = vmul.f32 %v69_v7, %v66_v6  ;;  %v75_v14 = vmul.f32 %v74_v8, %v64_v5  ;;  %v77_v15 = vmul.f32 %v76_v9, %v66_v6  ;;  %v72_v17 = vld [vmem:[%s778_s0 + $0x16] sm:$0x1]  ;;  %v79_v18 = vld [vmem:[%s778_s0 + $0x19] sm:$0x1]  ;;  %v86_v25 = vld [vmem:[%s778_s0 + $0x1c] sm:$0x1] }
  0x2a   :  { %v82_v19 = vmul.f32 %v81_v10, %v64_v5  ;;  %v84_v20 = vmul.f32 %v83_v16, %v66_v6  ;;  %v91_v32 = vld [vmem:[%s778_s0 + $0xb] sm:$0x1]  ;;  %v93_v33 = vld [vmem:[%s778_s0 + $0xc] sm:$0x1]  ;;  %v96_v37 = vld [vmem:[%s778_s0 + $0xd] sm:$0x1] }
  0x2b   :  { %v58_v21 = vstv %s420_s5  ;;  %v61_v22 = vstv %s60_s6  ;;  %v71_v23 = vadd.f32 %v70_v13, %v68_v12  ;;  %v78_v24 = vadd.f32 %v77_v15, %v75_v14  ;;  %v107_v38 = vld [vmem:[%s778_s0 + $0x11] sm:$0x1]  ;;  %v109_v39 = vld [vmem:[%s778_s0 + $0x12] sm:$0x1]  ;;  %s599_s14 = sld [smem:[#allocation4]]  ;;  %s601_s15 = sld [smem:[#allocation4 + $0x1]] }
  0x2c   :  { %v59_v26 = vmul.f32 %v58_v21, %v56_v11  ;;  %v85_v27 = vadd.f32 %v84_v20, %v82_v19  ;;  %v112_v40 = vld [vmem:[%s778_s0 + $0x13] sm:$0x1]  ;;  %v145_v46 = vld [vmem:[%s778_s0 + $0x6] sm:$0x1]  ;;  %s608_s18 = sld [smem:[#allocation4 + $0x2]]  ;;  %s615_s21 = sld [smem:[#allocation4 + $0x3]] }
  0x2d   :  { %v73_v28 = vadd.f32 %v72_v17, %v71_v23  ;;  %v80_v29 = vadd.f32 %v79_v18, %v78_v24  ;;  %v613_v49 = vld [vmem:[%s778_s0 + $0x2] sm:$0x1]  ;;  %s617_s22 = sld [smem:[#allocation4 + $0x4]]  ;;  %s619_s23 = sld [smem:[#allocation4 + $0x5]]  ;;  %v146_v51 = vmul.f32 1.442695, %v145_v46 }
  0x2e   :  { %v62_v30 = vadd.f32 %v61_v22, %v59_v26  ;;  %v87_v31 = vadd.f32 %v86_v25, %v85_v27  ;;  %v149_v54 = vld [vmem:[%s778_s0 + $0x7] sm:$0x1]  ;;  %v153_v55 = vld [vmem:[%s778_s0 + $0x8] sm:$0x1]  ;;  %v634_v56 = vld [vmem:[%s778_s0 + $0xa] sm:$0x1] }
  0x2f   :  { %s636_s28 = sld [smem:[#allocation4 + $0x6]]  ;;  %v159_v57 = vld [vmem:[%s778_s0 + $0x9] sm:$0x1]  ;;  %vm115_vm0 = vcmp.eq.f32.partialorder %v613_v49, 0.0  ;;  %vm125_vm1 = vcmp.eq.f32.partialorder %v613_v49, 1.0  ;;  %s644_s30 = sld [smem:[#allocation4 + $0x7]]  ;;  %445 = vpow2.f32 %v146_v51 }
  0x30   :  { %v88_v34 = vmul.f32 %v73_v28, %v62_v30  ;;  %v89_v35 = vmul.f32 %v80_v29, %v62_v30  ;;  %v585_v36 = vmul.f32 %v87_v31, %v62_v30  ;;  %s646_s7 = sld [smem:[#allocation4 + $0x8]]  ;;  %v150_v61 = vmul.f32 1.442695, %v149_v54  ;;  %v99_v3 = vld [vmem:[%s778_s0 + $0xe] sm:$0x1] }
  0x31   :  { %v117_v58 = vstv %s599_s14  ;;  %v120_v60 = vstv %s601_s15  ;;  %v154_v62 = vmul.f32 1.442695, %v153_v55  ;;  %v650_v63 = vadd.f32 1e-07, %v634_v56  ;;  %v101_v6 = vld [vmem:[%s778_s0 + $0xf] sm:$0x1] }
  0x32   :  { %v92_v41 = vmul.f32 %v91_v32, %v88_v34  ;;  %v94_v42 = vmul.f32 %v93_v33, %v89_v35  ;;  %v97_v43 = vmul.f32 %v96_v37, %v585_v36  ;;  %v108_v44 = vmul.f32 %v107_v38, %v88_v34  ;;  %v104_v21 = vld [vmem:[%s778_s0 + $0x10] sm:$0x1]  ;;  %s354_s3 = sld [smem:[#allocation6]] }
  0x33   :  { %v110_v45 = vmul.f32 %v109_v39, %v89_v35  ;;  %v113_v48 = vmul.f32 %v112_v40, %v585_v36  ;;  %v162_v0 = vmul.f32 %v159_v57, %v159_v57  ;;  %v123_v4 = vstv %s608_s18 }
  0x34   :  { %v95_v47 = vadd.f32 %v94_v42, %v92_v41  ;;  %vm135_vm2 = vcmp.eq.f32.partialorder %v613_v49, 2.0  ;;  %447 = vpow2.f32 %v150_v61  ;;  %v163_v5 = vmul.f32 %v650_v63, %v650_v63 }
  0x35   :  { %v111_v50 = vadd.f32 %v110_v45, %v108_v44  ;;  %v118_v7 = vsel %vm115_vm0, %v117_v58, 0.0  ;;  %v127_v8 = vstv %s615_s21  ;;  %449 = vpow2.f32 %v154_v62 }
  0x36   :  { %v621_v52 = vadd.f32 %v97_v43, %v95_v47  ;;  %v121_v10 = vsel %vm115_vm0, %v120_v60, 0.0  ;;  %v130_v11 = vstv %s617_s22  ;;  %v164_v12 = vadd.f32 %v163_v5, %v162_v0 }
  0x37   :  { %v623_v53 = vadd.f32 %v113_v48, %v111_v50  ;;  %v100_v13 = vmul.f32 %v99_v3, %v88_v34  ;;  %v124_v14 = vsel %vm115_vm0, %v123_v4, 0.0  ;;  %v133_v15 = vstv %s619_s23 }
  0x38   :  { %v178_v2 = vmul.f32 %v621_v52, %v621_v52  ;;  %v102_v17 = vmul.f32 %v101_v6, %v89_v35  ;;  %v128_v18 = vsel %vm125_vm1, %v127_v8, %v118_v7  ;;  %451 = vrsqrt.f32 %v164_v12 }
  0x39   :  { %v653_v1 = vadd.f32 1e-07, %v623_v53  ;;  %vm166_vm3 = vcmp.ge.f32.partialorder %v650_v63, 0.0  ;;  %v131_v19 = vsel %vm125_vm1, %v130_v11, %v121_v10  ;;  %v140_v20 = vstv %s644_s30  ;;  %v446_v30 = vpop.eup %445  ;;  %s438_s30 = sld [smem:[#allocation6 + $0x1]] }
  0x3a   :  { %v134_v22 = vsel %vm125_vm1, %v133_v15, %v124_v14  ;;  %v137_v23 = vstv %s636_s28  ;;  %v143_v24 = vstv %s646_s7  ;;  %v204_v25 = vshrl.u32 %v203_v59, 7 }
  0x3b   :  { %v179_v9 = vmul.f32 %v653_v1, %v653_v1  ;;  %vm182_vm4 = vcmp.ge.f32.partialorder %v653_v1, 0.0  ;;  %v500_v26 = vmov -1.0   ;;  %v141_v28 = vsel %vm135_vm2, %v140_v20, %v131_v19 }
  0x3c   :  { %v167_v27 = vsel %vm166_vm3, 1.0, %v500_v26  ;;  %v183_v29 = vsel %vm182_vm4, 1.0, %v500_v26  ;;  %v103_v31 = vadd.f32 %v102_v17, %v100_v13  ;;  %v105_v32 = vmul.f32 %v104_v21, %v585_v36 }
  0x3d   :  { %v180_v16 = vadd.f32 %v179_v9, %v178_v2  ;;  %v138_v33 = vsel %vm135_vm2, %v137_v23, %v128_v18  ;;  %v144_v34 = vsel %vm135_vm2, %v143_v24, %v134_v22  ;;  %v168_v37 = vmul.f32 %v167_v27, %v159_v57 }
  0x3e   :  { %v448_v35 = vpop.eup %447  ;;  %v170_v38 = vand.u32 2147483647, %v650_v63  ;;  %vm205_vm5 = vcmp.ge.s32.totalorder %v204_v25, 1  ;;  %vm206_vm6 = vcmp.le.s32.totalorder %v204_v25, 4  ;;  %v184_v41 = vmul.f32 %v183_v29, %v621_v52 }
  0x3f   :  { %453 = vrsqrt.f32 %v180_v16  ;;  %v450_v39 = vpop.eup %449  ;;  %v700_v40 = vmul.f32 %v448_v35, %v141_v28  ;;  %v186_v42 = vand.u32 2147483647, %v653_v1  ;;  %v213_v36 = vand.u32 3, %v204_v25  ;;  %vm207_vm9 = vmand %vm205_vm5, %vm206_vm6 }
  0x40   :  { %v704_v43 = vmul.f32 %v446_v30, %v138_v33  ;;  %vm223_vm7 = vcmp.ge.s32.totalorder %v204_v25, 3  ;;  %vm224_vm8 = vcmp.le.s32.totalorder %v204_v25, 6  ;;  %v706_v44 = vsub.s32 0, %v204_v25 }
  0x41   :  { %v106_v45 = vadd.f32 %v105_v32, %v103_v31  ;;  %v157_v46 = vmul.f32 0.5, %v700_v40  ;;  %v709_v48 = vmul.f32 %v450_v39, %v144_v34  ;;  %vm172_vm10 = vcmp.ge.f32.partialorder %v634_v56, 0.0  ;;  %vm225_vm12 = vmand %vm223_vm7, %vm224_vm8  ;;  %v430_v32 = vld [vmem:[%s778_s0 + $0x24] ss:$0 sm:$0xff]  ;;  %v429_v39 = vld [vmem:[%s778_s0 + $0x23] ss:$0 sm:$0xff] }
  0x42   :  { %v452_v47 = vpop.eup %451  ;;  %vm221_vm11 = vcmp.le.s32.totalorder %v213_v36, 1  ;;  %v379_v54 = vrot.slane %v623_v53, 7  ;;  %v501_v58 = vmov -0.5   ;;  %v230_v60 = vrot.slane %v704_v43, %v706_v44 }
  0x43   :  { %v169_v50 = vmul.f32 %v452_v47, %v168_v37  ;;  %v171_v51 = vmul.f32 %v452_v47, %v170_v38  ;;  %v208_v59 = vsel %vm207_vm9, 0.5, %v501_v58  ;;  %v158_v61 = vadd.f32 %v157_v46, %v106_v45  ;;  %v431_v45 = vld [vmem:[%s778_s0 + $0x25] ss:$0 sm:$0xff] }
  0x44   :  { %v235_v0 = vrot.slane %v700_v40, %v706_v44  ;;  %v502_v1 = vmov 0.0   ;;  %v226_v3 = vsel %vm225_vm12, 0.5, %v501_v58  ;;  %v240_v4 = vrot.slane %v709_v48, %v706_v44 }
  0x45   :  { %v173_v62 = vsub.f32 0.0, %v169_v50  ;;  %v175_v63 = vsub.f32 0.0, %v171_v51  ;;  %v222_v2 = vsel %vm221_vm11, -1.0, %v502_v1  ;;  %vm393_vm13 = vcmask 1040384  }
  0x46   :  { %vm395_vm14 = vcmask 1041408   ;;  %v407_v7 = vsel %vm393_vm13, %v158_v61, %v379_v54  ;;  %v231_v12 = vmul.f32 %v230_v60, %v208_v59  ;;  %v236_v13 = vmul.f32 %v235_v0, %v222_v2 }
  0x47   :  { %v174_v5 = vsel %vm172_vm10, %v169_v50, %v173_v62  ;;  %v176_v6 = vsel %vm172_vm10, %v175_v63, %v171_v51  ;;  %v261_v14 = vrot.slane %v158_v61, %v706_v44  ;;  %v241_v18 = vmul.f32 %v240_v4, %v226_v3  ;;  %v436_v50 = vld [vmem:[%s778_s0 + $0x21] ss:$0 sm:$0xff]  ;;  %v434_v61 = vld [vmem:[%s778_s0 + $0x1f] ss:$0 sm:$0xff]  ;;  %v437_v62 = vld [vmem:[%s778_s0 + $0x22] ss:$0 sm:$0xff] }
  0x48   :  { %v382_v15 = vrot.slane %v176_v6, 6  ;;  %v385_v19 = vrot.slane %v174_v5, 5  ;;  %v256_v56 = vrot.slane %v621_v52, %v706_v44  ;;  %vm397_vm15 = vcmask 1042432  }
  0x49   :  { %v454_v49 = vpop.eup %453  ;;  %v262_v25 = vadd.f32 %v261_v14, %v236_v13  ;;  %vm399_vm0 = vcmask 1043456   ;;  %vm401_vm1 = vcmask 1044480   ;;  %v274_v37 = vrot.slane %v623_v53, %v706_v44  ;;  %v432_v53 = vld [vmem:[%s778_s0 + $0x1d] ss:$0 sm:$0xff] }
  0x4a   :  { %v185_v55 = vmul.f32 %v454_v49, %v184_v41  ;;  %v187_v57 = vmul.f32 %v454_v49, %v186_v42  ;;  %v408_v20 = vsel %vm395_vm14, %v407_v7, %v382_v15  ;;  %v435_v49 = vld [vmem:[%s778_s0 + $0x20] ss:$0 sm:$0xff]  ;;  %vm403_vm2 = vcmask 1045504  }
  0x4b   :  { %v409_v27 = vsel %vm397_vm15, %v408_v20, %v385_v19  ;;  %v285_v36 = vmul.f32 %v430_v32, %v262_v25  ;;  %v321_v60 = vmul.f32 %v436_v50, %v262_v25  ;;  %vm405_vm3 = vcmask 1046528  }
  0x4c   :  { %v188_v8 = vmul.f32 %v187_v57, %v174_v5  ;;  %v189_v9 = vmul.f32 %v185_v55, %v176_v6  ;;  %v191_v10 = vmul.f32 %v187_v57, %v176_v6  ;;  %v192_v11 = vmul.f32 %v185_v55, %v174_v5 }
  0x4e   :  { %v190_v16 = vsub.f32 %v188_v8, %v189_v9  ;;  %v193_v17 = vadd.f32 %v192_v11, %v191_v10 }
  0x50   :  { %v245_v21 = vrot.slane %v190_v16, %v706_v44  ;;  %v250_v22 = vrot.slane %v193_v17, %v706_v44  ;;  %v263_v23 = vsub.f32 0.0, %v193_v17  ;;  %v388_v24 = vrot.slane %v193_v17, 4 }
  0x51   :  { %v391_v26 = vrot.slane %v190_v16, 3 }
  0x52   :  { %v246_v28 = vmul.f32 %v245_v21, %v231_v12  ;;  %v251_v29 = vmul.f32 %v250_v22, %v241_v18  ;;  %v267_v30 = vrot.slane %v263_v23, %v706_v44  ;;  %v269_v31 = vmul.f32 %v245_v21, %v241_v18  ;;  %v433_v44 = vld [vmem:[%s778_s0 + $0x1e] ss:$0 sm:$0xff] }
  0x53   :  { %v410_v33 = vsel %vm399_vm0, %v409_v27, %v388_v24  ;;  %v303_v58 = vmul.f32 %v433_v44, %v262_v25 }
  0x54   :  { %v252_v34 = vadd.f32 %v251_v29, %v246_v28  ;;  %v268_v35 = vmul.f32 %v267_v30, %v231_v12  ;;  %v411_v38 = vsel %vm401_vm1, %v410_v33, %v391_v26  ;;  %v357_v29 = vstv %s354_s3 }
  0x55   :  { %413 = vst [vmem:[%s782_s4 + $0x8] sm:$0x3f] %v411_v38  ;;  %v360_v30 = vstv %s438_s30 }
  0x56   :  { %v257_v41 = vadd.f32 %v256_v56, %v252_v34  ;;  %v270_v42 = vadd.f32 %v269_v31, %v268_v35 }
  0x58   :  { %v275_v46 = vadd.f32 %v274_v37, %v270_v42  ;;  %v280_v47 = vmul.f32 %v429_v39, %v257_v41  ;;  %v298_v57 = vmul.f32 %v432_v53, %v257_v41  ;;  %v316_v59 = vmul.f32 %v435_v49, %v257_v41 }
  0x59   :  { %v367_v41 = vrot.slane %v700_v40, 4  ;;  %v370_v42 = vrot.slane %v709_v48, 3 }
  0x5a   :  { %v286_v51 = vadd.f32 %v285_v36, %v280_v47  ;;  %v291_v54 = vmul.f32 %v431_v45, %v275_v46  ;;  %v304_v63 = vadd.f32 %v303_v58, %v298_v57  ;;  %v309_v0 = vmul.f32 %v434_v61, %v275_v46 }
  0x5b   :  { %v322_v1 = vadd.f32 %v321_v60, %v316_v59  ;;  %v327_v2 = vmul.f32 %v437_v62, %v275_v46  ;;  %v373_v45 = vrot.slane %v704_v43, 2  ;;  %v376_v47 = vrot.slane %v621_v52, 1 }
  0x5c   :  { %v292_v55 = vadd.f32 %v291_v54, %v286_v51  ;;  %v310_v3 = vadd.f32 %v309_v0, %v304_v63 }
  0x5d   :  { %v328_v4 = vadd.f32 %v327_v2, %v322_v1 }
  0x5e   :  { %455 = vrcp.f32 %v292_v55 }
  0x68   :  { %v456_v5 = vpop.eup %455 }
  0x69   :  { %v311_v6 = vmul.f32 %v456_v5, %v310_v3  ;;  %v329_v7 = vmul.f32 %v456_v5, %v328_v4 }
  0x6b   :  { %v330_v8 = vrot.slane %v311_v6, 4  ;;  %v342_v9 = vrot.slane %v329_v7, 4 }
  0x6d   :  { %v331_v10 = vmin.f32 %v311_v6, %v330_v8  ;;  %v337_v11 = vmax.f32 %v311_v6, %v330_v8  ;;  %v343_v12 = vmin.f32 %v329_v7, %v342_v9  ;;  %v349_v13 = vmax.f32 %v329_v7, %v342_v9 }
  0x6f   :  { %v332_v14 = vrot.slane %v331_v10, 2  ;;  %v338_v15 = vrot.slane %v337_v11, 2  ;;  %v344_v16 = vrot.slane %v343_v12, 2  ;;  %v350_v17 = vrot.slane %v349_v13, 2 }
  0x71   :  { %v333_v18 = vmin.f32 %v331_v10, %v332_v14  ;;  %v339_v19 = vmax.f32 %v337_v11, %v338_v15  ;;  %v345_v56 = vmin.f32 %v343_v12, %v344_v16  ;;  %v351_v20 = vmax.f32 %v349_v13, %v350_v17 }
  0x73   :  { %v334_v21 = vrot.slane %v333_v18, 1  ;;  %v340_v22 = vrot.slane %v339_v19, 1  ;;  %v346_v23 = vrot.slane %v345_v56, 1  ;;  %v352_v24 = vrot.slane %v351_v20, 1 }
  0x75   :  { %v335_v25 = vmin.f32 %v333_v18, %v334_v21  ;;  %v341_v26 = vmax.f32 %v339_v19, %v340_v22  ;;  %v347_v27 = vmin.f32 %v345_v56, %v346_v23  ;;  %v353_v28 = vmax.f32 %v351_v20, %v352_v24 }
  0x77   :  { %v356_v31 = vmax.f32 %v335_v25, 0.0  ;;  %v359_v32 = vmax.f32 %v347_v27, 0.0  ;;  %v362_v33 = vmax.f32 %v341_v26, 0.0  ;;  %v364_v34 = vmax.f32 %v353_v28, 0.0 }
  0x79   :  { %v358_v35 = vmin.f32 %v357_v29, %v356_v31  ;;  %v361_v37 = vmin.f32 %v360_v30, %v359_v32  ;;  %v363_v38 = vmin.f32 %v357_v29, %v362_v33  ;;  %v365_v39 = vmin.f32 %v360_v30, %v364_v34 }
  0x7b   :  { %v394_v36 = vsel %vm393_vm13, %v358_v35, %v361_v37 }
  0x7c   :  { %v396_v46 = vsel %vm395_vm14, %v394_v36, %v363_v38 }
  0x7d   :  { %v398_v53 = vsel %vm397_vm15, %v396_v46, %v365_v39 }
  0x7e   :  { %v400_v44 = vsel %vm399_vm0, %v398_v53, %v367_v41 }
  0x7f   :  { %v402_v49 = vsel %vm401_vm1, %v400_v44, %v370_v42 }
  0x80   :  { %v404_v50 = vsel %vm403_vm2, %v402_v49, %v373_v45 }
  0x81   :  { %v406_v40 = vsel %vm405_vm3, %v404_v50, %v376_v47 }
  0x82   :  { %412 = vst [vmem:[%s782_s4] sm:$0xff] %v406_v40 }
  0x83   :  { %418 = vsyncpa [#allocation3], 1 }
  0x84   :  { %419 = vsyncpa [#allocation5], 1 }

</bundles_post_ra>
